<compile_context>
chip_gen: v7x
topology: tpu7x:2x2x1
jax: 0.10.0
libtpu: 0.0.40
codegen_flags: <defaults>
</compile_context>

<pallas_src>
import functools
import math

import jax
import jax.numpy as jnp
from jax import lax
from jax.experimental import pallas as pl
from jax.experimental.pallas import tpu as pltpu


MXU_DTYPE = jnp.bfloat16     # MXU operand dtype (f32 accumulation everywhere)
LANE = 128                   # lane-dense padding for the tiny classifier output


# ----------------------------- in-kernel helpers -----------------------------

def _mm(a, b):
    """2-D matmul, bf16 operands, f32 accumulation."""
    return jnp.dot(a.astype(MXU_DTYPE), b.astype(MXU_DTYPE),
                   preferred_element_type=jnp.float32)


def _bdot(a, b):
    """[g, m, k] x [g, k, n] -> [g, m, n]  (one batch dim, bf16 in, f32 out)."""
    return lax.dot_general(a.astype(MXU_DTYPE), b.astype(MXU_DTYPE),
                           (((2,), (1,)), ((0,), (0,))),
                           preferred_element_type=jnp.float32)


def _bdot_tt(a, b):
    """[g, s, d] x [g, t, d] -> [g, s, t]  (contract trailing dims)."""
    return lax.dot_general(a.astype(MXU_DTYPE), b.astype(MXU_DTYPE),
                           (((2,), (2,)), ((0,), (0,))),
                           preferred_element_type=jnp.float32)


def _gelu(x):
    # TODO(synk): HF BERT default is the exact erf GELU; tanh approx used here.
    return 0.5 * x * (1.0 + jnp.tanh(0.7978845608028654
                                     * (x + 0.044715 * x * x * x)))


def _ln(x, g, b, eps):
    mu = jnp.mean(x, axis=-1, keepdims=True)
    var = jnp.mean(jnp.square(x - mu), axis=-1, keepdims=True)
    return (x - mu) * lax.rsqrt(var + eps) * g + b


# --------------------------- fused encoder kernel ---------------------------

def _encoder_kernel(idx_ref,                                   # scalar prefetch
                    mask_ref, emb_ref, embln_ref,
                    wqkv_ref, bqkv_ref, wo_ref, wff1_ref, wff2_ref, vec_ref,
                    fcw_ref, fcb_ref,
                    hid_ref, trig_ref, logit_ref,
                    h_ref,
                    *, B, S, NH, DH, H, I, T, eps):
    """One full BERT encoder layer per grid step; activation stays in VMEM.

    On the last layer step the span gather + classifier fc run in-place on the
    VMEM-resident hidden state (no extra kernel launch / HBM round trip).
    """
    layer = pl.program_id(0)
    G = B * NH
    M = B * S

    @pl.when(layer == 0)
    def _():
        # Embedding LayerNorm fused into layer 0; result persists in VMEM.
        h_ref[...] = _ln(emb_ref[...], embln_ref[0:1, :], embln_ref[1:2, :], eps)

    h = h_ref[...]                                             # [M, H] f32

    # Per-layer packed vectors (single DMA per layer step).
    vecs = vec_ref[0]                                          # [7, P] f32
    bo = vecs[0:1, :H]
    ln1_g = vecs[1:2, :H]
    ln1_b = vecs[2:3, :H]
    bff1 = vecs[3:4, :I]
    bff2 = vecs[4:5, :H]
    ln2_g = vecs[5:6, :H]
    ln2_b = vecs[6:7, :H]

    # ---------------- head-batched self-attention ----------------
    # Group index g = head * B + batch (no lane slicing, no concatenates).
    h_g = jnp.broadcast_to(h.reshape(B, S, H)[None],
                           (NH, B, S, H)).reshape(G, S, H).astype(MXU_DTYPE)

    def _proj(j):
        w = jnp.broadcast_to(wqkv_ref[0, j][:, None],
                             (NH, B, H, DH)).reshape(G, H, DH)
        return _bdot(h_g, w) + bqkv_ref[0, j]                  # [G, S, DH] f32

    q = _proj(0)          # 1/sqrt(DH) pre-folded into the Q weights/bias
    k = _proj(1)
    v = _proj(2)

    s = _bdot_tt(q, k) + mask_ref[...]                         # [G, S, S] f32
    s = s - jnp.max(s, axis=-1, keepdims=True)
    p = jnp.exp(s)
    p = p / jnp.sum(p, axis=-1, keepdims=True)                 # exact softmax
    ctx = _bdot(p, v)                                          # [G, S, DH] f32

    wo_g = jnp.broadcast_to(wo_ref[0][:, None],
                            (NH, B, DH, H)).reshape(G, DH, H)
    attn = _bdot(ctx, wo_g)                                    # [G, S, H] per-head
    attn = jnp.sum(attn.reshape(NH, M, H), axis=0) + bo        # [M, H]

    h1 = _ln(attn + h, ln1_g, ln1_b, eps)

    # ---------------- feed-forward ----------------
    ff = _gelu(_mm(h1, wff1_ref[0]) + bff1)                    # [M, I]
    ffo = _mm(ff, wff2_ref[0]) + bff2                          # [M, H]
    h_new = _ln(ffo + h1, ln2_g, ln2_b, eps)

    h_ref[...] = h_new

    # ------- fused span gather + classifier on the last layer step -------
    @pl.when(layer == pl.num_programs(0) - 1)
    def _():
        hid_ref[...] = h_new.astype(hid_ref.dtype)
        rows = []
        for t in range(T):
            ia = idx_ref[0, t]
            ib = idx_ref[1, t]
            rows.append(h_ref[pl.ds(ia, 1), :] + h_ref[pl.ds(ib, 1), :])
        trig = jnp.concatenate(rows, axis=0)                   # [T, H] f32
        trig_ref[...] = trig.astype(trig_ref.dtype)
        logit_ref[...] = (jnp.dot(trig, fcw_ref[...],
                                  preferred_element_type=jnp.float32)
                          + fcb_ref[...]).astype(logit_ref.dtype)


def encoder_forward(emb_flat, mask_g, span_idx, kp, cfg, B, S):
    """Whole BERT encoder + span gather + classifier in ONE pallas_call."""
    L, H, I = cfg.num_layers, cfg.hidden, cfg.intermediate
    NH, DH = cfg.num_heads, cfg.head_dim
    G = B * NH
    M = B * S
    T = int(span_idx.shape[1])
    NV, P = int(kp["vecs"].shape[1]), int(kp["vecs"].shape[2])
    CP = int(kp["fc_w"].shape[1])

    kernel = functools.partial(_encoder_kernel, B=B, S=S, NH=NH, DH=DH,
                               H=H, I=I, T=T, eps=cfg.layer_norm_eps)

    grid_spec = pltpu.PrefetchScalarGridSpec(
        num_scalar_prefetch=1,                                  # span indices
        grid=(L,),
        in_specs=[
            pl.BlockSpec((G, 1, S), lambda l, idx: (0, 0, 0)),          # additive mask
            pl.BlockSpec((M, H), lambda l, idx: (0, 0)),                # embeddings
            pl.BlockSpec((2, H), lambda l, idx: (0, 0)),                # emb LN g/b
            pl.BlockSpec((1, 3, NH, H, DH),
                         lambda l, idx: (l, 0, 0, 0, 0)),               # W_q/k/v (bf16)
            pl.BlockSpec((1, 3, G, 1, DH),
                         lambda l, idx: (l, 0, 0, 0, 0)),               # b_q/k/v
            pl.BlockSpec((1, NH, DH, H), lambda l, idx: (l, 0, 0, 0)),  # W_attn_out
            pl.BlockSpec((1, H, I), lambda l, idx: (l, 0, 0)),          # W_ffn_in
            pl.BlockSpec((1, I, H), lambda l, idx: (l, 0, 0)),          # W_ffn_out
            pl.BlockSpec((1, NV, P), lambda l, idx: (l, 0, 0)),         # packed vectors
            pl.BlockSpec((H, CP), lambda l, idx: (0, 0)),               # fc weight (padded)
            pl.BlockSpec((1, CP), lambda l, idx: (0, 0)),               # fc bias (padded)
        ],
        out_specs=(pl.BlockSpec((M, H), lambda l, idx: (0, 0)),
                   pl.BlockSpec((T, H), lambda l, idx: (0, 0)),
                   pl.BlockSpec((T, CP), lambda l, idx: (0, 0))),
        scratch_shapes=[pltpu.VMEM((M, H), jnp.float32)],               # resident act.
    )

    return pl.pallas_call(
        kernel,
        out_shape=(jax.ShapeDtypeStruct((M, H), jnp.float32),
                   jax.ShapeDtypeStruct((T, H), jnp.float32),
                   jax.ShapeDtypeStruct((T, CP), jnp.float32)),
        grid_spec=grid_spec,
        compiler_params=pltpu.CompilerParams(
            dimension_semantics=("arbitrary",)),                # layers are sequential
    )(span_idx, mask_g, emb_flat, kp["emb_ln"],
      kp["wqkv"], kp["bqkv"], kp["wo"], kp["wff1"], kp["wff2"], kp["vecs"],
      kp["fc_w"], kp["fc_b"])


# -------------------- small generic linear (aug path only) --------------------

def _linear_kernel(x_ref, w_ref, b_ref, o_ref):
    o_ref[...] = (jnp.dot(x_ref[...], w_ref[...],
                          preferred_element_type=jnp.float32)
                  + b_ref[...]).astype(o_ref.dtype)


def linear(x, w, b):
    M, K = x.shape
    N = w.shape[1]
    return pl.pallas_call(
        _linear_kernel,
        out_shape=jax.ShapeDtypeStruct((M, N), jnp.float32),
        grid=(1,),
        in_specs=[pl.BlockSpec((M, K), lambda i: (0, 0)),
                  pl.BlockSpec((K, N), lambda i: (0, 0)),
                  pl.BlockSpec((1, N), lambda i: (0, 0))],
        out_specs=pl.BlockSpec((M, N), lambda i: (0, 0)),
    )(x, w, b)


# ----------------------------- Synthetic model -----------------------------

class Config:
    vocab_size = 100
    hidden = 32
    num_heads = 2
    head_dim = 16
    intermediate = 64
    num_layers = 2
    max_pos = 16
    layer_norm_eps = 1e-12
    class_num = 4          # fc output dim = class_num + 1


def init_params(key, cfg):
    """Deterministic synthetic stand-in for the pretrained BERT backbone."""
    H, Iw, L = cfg.hidden, cfg.intermediate, cfg.num_layers
    ks = jax.random.split(key, 16)

    def w(kk, shape):
        return jax.random.normal(kk, shape, jnp.float32) * 0.02

    return {
        "word_emb": w(ks[0], (cfg.vocab_size, H)),
        "pos_emb": w(ks[1], (cfg.max_pos, H)),
        "type_emb": w(ks[2], (2, H)),
        "emb_ln_g": jnp.ones((H,), jnp.float32),
        "emb_ln_b": jnp.zeros((H,), jnp.float32),
        "fc_w": w(ks[3], (H, cfg.class_num + 1)),
        "fc_b": jnp.zeros((cfg.class_num + 1,), jnp.float32),
        # encoder weights stacked along a leading layer axis
        "wq": w(ks[4], (L, H, H)),
        "wk": w(ks[5], (L, H, H)),
        "wv": w(ks[6], (L, H, H)),
        "bq": w(ks[7], (L, H)),
        "bk": w(ks[8], (L, H)),
        "bv": w(ks[9], (L, H)),
        "wo": w(ks[10], (L, H, H)),
        "bo": w(ks[11], (L, H)),
        "ln1_g": jnp.ones((L, H), jnp.float32),
        "ln1_b": jnp.zeros((L, H), jnp.float32),
        "wff1": w(ks[12], (L, H, Iw)),
        "bff1": w(ks[13], (L, Iw)),
        "wff2": w(ks[14], (L, Iw, H)),
        "bff2": w(ks[15], (L, H)),
        "ln2_g": jnp.ones((L, H), jnp.float32),
        "ln2_b": jnp.zeros((L, H), jnp.float32),
    }


def prep_kernel_params(params, cfg, B):
    """Host-side repack of weights into the kernel's layouts (runs once)."""
    H, Iw, L = cfg.hidden, cfg.intermediate, cfg.num_layers
    NH, DH = cfg.num_heads, cfg.head_dim
    G = B * NH
    P = max(H, Iw)
    scale = 1.0 / math.sqrt(DH)

    # Q/K/V weights in per-head form [L, 3, NH, H, DH]; 1/sqrt(DH) folded into Q.
    wqkv = jnp.stack([params["wq"] * scale, params["wk"], params["wv"]], axis=1)
    wqkv = wqkv.reshape(L, 3, H, NH, DH).transpose(0, 1, 3, 2, 4)

    # Q/K/V biases head-batched to [L, 3, G, 1, DH] with g = head * B + batch.
    bqkv = jnp.stack([params["bq"] * scale, params["bk"], params["bv"]], axis=1)
    bqkv = bqkv.reshape(L, 3, NH, DH)
    bqkv = jnp.broadcast_to(bqkv[:, :, :, None, :],
                            (L, 3, NH, B, DH)).reshape(L, 3, G, 1, DH)

    wo = params["wo"].reshape(L, NH, DH, H)

    def _pad_row(v):
        return jnp.pad(v, ((0, 0), (0, P - v.shape[1])))

    vecs = jnp.stack([_pad_row(params["bo"]),
                      _pad_row(params["ln1_g"]), _pad_row(params["ln1_b"]),
                      _pad_row(params["bff1"]), _pad_row(params["bff2"]),
                      _pad_row(params["ln2_g"]), _pad_row(params["ln2_b"])],
                     axis=1)                                     # [L, 7, P]

    emb_ln = jnp.stack([params["emb_ln_g"], params["emb_ln_b"]], axis=0)

    C = params["fc_w"].shape[1]
    fc_w = jnp.pad(params["fc_w"], ((0, 0), (0, LANE - C)))      # lane-dense
    fc_b = jnp.pad(params["fc_b"], (0, LANE - C)).reshape(1, LANE)

    return {
        "wqkv": wqkv.astype(MXU_DTYPE),
        "bqkv": bqkv.astype(jnp.float32),
        "wo": wo.astype(MXU_DTYPE),
        "wff1": params["wff1"].astype(MXU_DTYPE),
        "wff2": params["wff2"].astype(MXU_DTYPE),
        "vecs": vecs.astype(jnp.float32),
        "emb_ln": emb_ln.astype(jnp.float32),
        "fc_w": fc_w.astype(jnp.float32),
        "fc_b": fc_b.astype(jnp.float32),
    }


def bert_ed_forward(params, cfg, x_ids, masks, span=None, aug=None):
    """Mirrors BertED.forward (is_input_mapping=False). Dropout is identity (eval)."""
    B, S = x_ids.shape
    H, NH = cfg.hidden, cfg.num_heads
    G = B * NH
    C = cfg.class_num + 1
    assert span is not None, "BertED.forward requires span (reference semantics)"

    kp = prep_kernel_params(params, cfg, B)

    # --- BERT embeddings (tiny gathers kept as XLA glue; embedding LayerNorm
    #     is fused into layer 0 of the encoder kernel; token_type_ids == 0). ---
    emb = (params["word_emb"][x_ids]
           + params["pos_emb"][:S][None, :, :]
           + params["type_emb"][0][None, None, :]).reshape(B * S, H)

    add_mask = (1.0 - masks.astype(jnp.float32)) * -10000.0           # [B, S]
    mask_g = jnp.broadcast_to(add_mask[None, :, None, :],
                              (NH, B, 1, S)).reshape(G, 1, S)          # head-batched

    # Span indices flattened to rows of the [B*S, H] hidden-state matrix.
    spa = jnp.concatenate([span[i][:, 0] + i * S
                           for i in range(len(span))]).astype(jnp.int32)
    spb = jnp.concatenate([span[i][:, 1] + i * S
                           for i in range(len(span))]).astype(jnp.int32)
    span_idx = jnp.stack([spa, spb], axis=0)                           # [2, T]

    # --- full encoder + fused span gather + fc: one pallas_call ---
    last_hidden_flat, trig_feature, logits_pad = encoder_forward(
        emb, mask_g, span_idx, kp, cfg, B, S)

    # NOTE: the BERT pooler output (backbone_output[1]) is never consumed in
    # BertED.forward, so the dead pooler matmul is not computed here.

    return_dict = {}
    return_dict["reps"] = last_hidden_flat.reshape(B, S, H)[:, 0, :]
    return_dict["outputs"] = logits_pad[:, :C]
    return_dict["context_feat"] = last_hidden_flat
    return_dict["trig_feat"] = trig_feature

    if aug is not None:
        noise = jax.random.normal(jax.random.PRNGKey(1), trig_feature.shape,
                                  trig_feature.dtype)
        feature_aug = trig_feature + noise * aug
        outputs_aug = linear(feature_aug, kp["fc_w"], kp["fc_b"])[:, :C]
        return_dict["feature_aug"] = feature_aug
        return_dict["outputs_aug"] = outputs_aug

    return return_dict


# ----------------------------------- main -----------------------------------

if __name__ == "__main__":
    cfg = Config()
    key = jax.random.PRNGKey(0)
    pkey, xkey, skey = jax.random.split(key, 3)

    params = init_params(pkey, cfg)

    B, S = 2, 8
    x_ids = jax.random.randint(xkey, (B, S), 0, cfg.vocab_size, dtype=jnp.int32)
    masks = jnp.ones((B, S), dtype=jnp.float32)
    # 4 spans per example; each span row is (start_token_idx, end_token_idx).
    span = [jax.random.randint(jax.random.fold_in(skey, i), (4, 2), 0, S,
                               dtype=jnp.int32) for i in range(B)]

    out = bert_ed_forward(params, cfg, x_ids, masks, span=span, aug=None)
    jax.block_until_ready(out)

    assert out["outputs"].shape == (2 * 4, cfg.class_num + 1)
    assert out["trig_feat"].shape == (2 * 4, cfg.hidden)
    assert out["context_feat"].shape == (B * S, cfg.hidden)
    assert out["reps"].shape == (B, cfg.hidden)
    assert bool(jnp.isfinite(out["outputs"]).all())
    assert bool(jnp.isfinite(out["context_feat"]).all())
    print("KERNEL_OK")
</pallas_src>

<mosaic_0001>
module attributes {stable_mosaic.version = 11 : i64} {
  func.func @_encoder_kernel(%arg0: i32, %arg1: memref<2x8xi32, #tpu.memory_space<smem>>, %arg2: memref<4x1x8xf32, #tpu.memory_space<vmem>>, %arg3: memref<16x32xf32, #tpu.memory_space<vmem>>, %arg4: memref<2x32xf32, #tpu.memory_space<vmem>>, %arg5: memref<1x3x2x32x16xbf16, #tpu.memory_space<vmem>>, %arg6: memref<1x3x4x1x16xf32, #tpu.memory_space<vmem>>, %arg7: memref<1x2x16x32xbf16, #tpu.memory_space<vmem>>, %arg8: memref<1x32x64xbf16, #tpu.memory_space<vmem>>, %arg9: memref<1x64x32xbf16, #tpu.memory_space<vmem>>, %arg10: memref<1x7x64xf32, #tpu.memory_space<vmem>>, %arg11: memref<32x128xf32, #tpu.memory_space<vmem>>, %arg12: memref<1x128xf32, #tpu.memory_space<vmem>>, %arg13: memref<16x32xf32, #tpu.memory_space<vmem>>, %arg14: memref<8x32xf32, #tpu.memory_space<vmem>>, %arg15: memref<8x128xf32, #tpu.memory_space<vmem>>, %arg16: memref<16x32xf32, #tpu.memory_space<vmem>>) attributes {dimension_semantics = [#tpu.dimension_semantics<arbitrary>], iteration_bounds = array<i64: 2>, scalar_prefetch = 1 : i64, scratch_operands = 1 : i64, tpu.core_type = #tpu.core_type<tc>, window_params = [{pipeline_mode = #tpu.pipeline_mode<synchronous>, transform_indices = @transform_0, window_bounds = array<i64: 4, 1, 8>}, {pipeline_mode = #tpu.pipeline_mode<synchronous>, transform_indices = @transform_1, window_bounds = array<i64: 16, 32>}, {pipeline_mode = #tpu.pipeline_mode<synchronous>, transform_indices = @transform_2, window_bounds = array<i64: 2, 32>}, {transform_indices = @transform_3, window_bounds = array<i64: 1, 3, 2, 32, 16>}, {transform_indices = @transform_4, window_bounds = array<i64: 1, 3, 4, 1, 16>}, {transform_indices = @transform_5, window_bounds = array<i64: 1, 2, 16, 32>}, {transform_indices = @transform_6, window_bounds = array<i64: 1, 32, 64>}, {transform_indices = @transform_7, window_bounds = array<i64: 1, 64, 32>}, {transform_indices = @transform_8, window_bounds = array<i64: 1, 7, 64>}, {pipeline_mode = #tpu.pipeline_mode<synchronous>, transform_indices = @transform_9, window_bounds = array<i64: 32, 128>}, {pipeline_mode = #tpu.pipeline_mode<synchronous>, transform_indices = @transform_10, window_bounds = array<i64: 1, 128>}, {pipeline_mode = #tpu.pipeline_mode<synchronous>, transform_indices = @transform_11, window_bounds = array<i64: 16, 32>}, {pipeline_mode = #tpu.pipeline_mode<synchronous>, transform_indices = @transform_12, window_bounds = array<i64: 8, 32>}, {pipeline_mode = #tpu.pipeline_mode<synchronous>, transform_indices = @transform_13, window_bounds = array<i64: 8, 128>}]} {
    %c0_i32 = arith.constant 0 : i32
    %0 = arith.cmpi eq, %arg0, %c0_i32 : i32
    %1 = arith.extui %0 : i1 to i32
    %c0_i32_0 = arith.constant 0 : i32
    %2 = arith.cmpi ne, %1, %c0_i32_0 : i32
    scf.if %2 {
      %c0_73 = arith.constant 0 : index
      %c0_74 = arith.constant 0 : index
      %157 = vector.load %arg3[%c0_73, %c0_74] : memref<16x32xf32, #tpu.memory_space<vmem>>, vector<16x32xf32>
      %c0_75 = arith.constant 0 : index
      %c0_76 = arith.constant 0 : index
      %158 = vector.load %arg4[%c0_75, %c0_76] : memref<2x32xf32, #tpu.memory_space<vmem>>, vector<1x32xf32>
      %c1_77 = arith.constant 1 : index
      %c0_78 = arith.constant 0 : index
      %159 = vector.load %arg4[%c1_77, %c0_78] : memref<2x32xf32, #tpu.memory_space<vmem>>, vector<1x32xf32>
      %cst_79 = arith.constant dense<0.000000e+00> : vector<16xf32>
      %160 = vector.multi_reduction <add>, %157, %cst_79 [1] : vector<16x32xf32> to vector<16xf32>
      %161 = vector.shape_cast %160 : vector<16xf32> to vector<16x1xf32>
      %cst_80 = arith.constant 3.200000e+01 : f32
      %162 = vector.broadcast %cst_80 : f32 to vector<16x1xf32>
      %163 = arith.divf %161, %162 : vector<16x1xf32>
      %164 = vector.broadcast %163 : vector<16x1xf32> to vector<16x32xf32>
      %165 = arith.subf %157, %164 : vector<16x32xf32>
      %166 = arith.mulf %165, %165 : vector<16x32xf32>
      %cst_81 = arith.constant dense<0.000000e+00> : vector<16xf32>
      %167 = vector.multi_reduction <add>, %166, %cst_81 [1] : vector<16x32xf32> to vector<16xf32>
      %168 = vector.shape_cast %167 : vector<16xf32> to vector<16x1xf32>
      %cst_82 = arith.constant 3.200000e+01 : f32
      %169 = vector.broadcast %cst_82 : f32 to vector<16x1xf32>
      %170 = arith.divf %168, %169 : vector<16x1xf32>
      %171 = vector.broadcast %163 : vector<16x1xf32> to vector<16x32xf32>
      %172 = arith.subf %157, %171 : vector<16x32xf32>
      %cst_83 = arith.constant 9.99999996E-13 : f32
      %173 = vector.broadcast %cst_83 : f32 to vector<16x1xf32>
      %174 = arith.addf %170, %173 : vector<16x1xf32>
      %175 = math.rsqrt %174 : vector<16x1xf32>
      %176 = vector.broadcast %175 : vector<16x1xf32> to vector<16x32xf32>
      %177 = arith.mulf %172, %176 : vector<16x32xf32>
      %178 = vector.broadcast %158 : vector<1x32xf32> to vector<16x32xf32>
      %179 = arith.mulf %177, %178 : vector<16x32xf32>
      %180 = vector.broadcast %159 : vector<1x32xf32> to vector<16x32xf32>
      %181 = arith.addf %179, %180 : vector<16x32xf32>
      %c0_84 = arith.constant 0 : index
      %c0_85 = arith.constant 0 : index
      %182 = vector.load %arg16[%c0_84, %c0_85] : memref<16x32xf32, #tpu.memory_space<vmem>>, vector<16x32xf32>
      tpu.vector_store %arg16[%c0_84, %c0_85], %181 {strides = array<i32>} : memref<16x32xf32, #tpu.memory_space<vmem>>, vector<16x32xf32>,
    } else {
    }
    %c0 = arith.constant 0 : index
    %c0_1 = arith.constant 0 : index
    %3 = vector.load %arg16[%c0, %c0_1] : memref<16x32xf32, #tpu.memory_space<vmem>>, vector<16x32xf32>
    %c0_2 = arith.constant 0 : index
    %c0_3 = arith.constant 0 : index
    %c0_4 = arith.constant 0 : index
    %4 = vector.load %arg10[%c0_2, %c0_3, %c0_4] : memref<1x7x64xf32, #tpu.memory_space<vmem>>, vector<1x7x64xf32>
    %5 = vector.shape_cast %4 : vector<1x7x64xf32> to vector<7x64xf32>
    %6 = vector.extract_strided_slice %5 {offsets = [0, 0], sizes = [1, 32], strides = [1, 1]} : vector<7x64xf32> to vector<1x32xf32>
    %7 = vector.extract_strided_slice %5 {offsets = [1, 0], sizes = [1, 32], strides = [1, 1]} : vector<7x64xf32> to vector<1x32xf32>
    %8 = vector.extract_strided_slice %5 {offsets = [2, 0], sizes = [1, 32], strides = [1, 1]} : vector<7x64xf32> to vector<1x32xf32>
    %9 = vector.extract_strided_slice %5 {offsets = [3, 0], sizes = [1, 64], strides = [1, 1]} : vector<7x64xf32> to vector<1x64xf32>
    %10 = vector.extract_strided_slice %5 {offsets = [4, 0], sizes = [1, 32], strides = [1, 1]} : vector<7x64xf32> to vector<1x32xf32>
    %11 = vector.extract_strided_slice %5 {offsets = [5, 0], sizes = [1, 32], strides = [1, 1]} : vector<7x64xf32> to vector<1x32xf32>
    %12 = vector.extract_strided_slice %5 {offsets = [6, 0], sizes = [1, 32], strides = [1, 1]} : vector<7x64xf32> to vector<1x32xf32>
    %13 = vector.shape_cast %3 : vector<16x32xf32> to vector<2x8x32xf32>
    %14 = vector.shape_cast %13 : vector<2x8x32xf32> to vector<1x2x8x32xf32>
    %15 = vector.shape_cast %14 : vector<1x2x8x32xf32> to vector<1x2x8x32xf32>
    %16 = vector.broadcast %15 : vector<1x2x8x32xf32> to vector<2x2x8x32xf32>
    %17 = vector.shape_cast %16 : vector<2x2x8x32xf32> to vector<4x8x32xf32>
    %18 = arith.truncf %17 : vector<4x8x32xf32> to vector<4x8x32xbf16>
    %c0_5 = arith.constant 0 : index
    %c0_6 = arith.constant 0 : index
    %c0_7 = arith.constant 0 : index
    %c0_8 = arith.constant 0 : index
    %c0_9 = arith.constant 0 : index
    %19 = vector.load %arg5[%c0_5, %c0_6, %c0_7, %c0_8, %c0_9] : memref<1x3x2x32x16xbf16, #tpu.memory_space<vmem>>, vector<1x1x2x32x16xbf16>
    %20 = vector.shape_cast %19 : vector<1x1x2x32x16xbf16> to vector<2x32x16xbf16>
    %21 = vector.shape_cast %20 : vector<2x32x16xbf16> to vector<2x1x32x16xbf16>
    %22 = vector.shape_cast %21 : vector<2x1x32x16xbf16> to vector<2x1x32x16xbf16>
    %23 = vector.broadcast %22 : vector<2x1x32x16xbf16> to vector<2x2x32x16xbf16>
    %24 = vector.shape_cast %23 : vector<2x2x32x16xbf16> to vector<4x32x16xbf16>
    %cst = arith.constant dense<0.000000e+00> : vector<4x8x16xf32>
    %25 = tpu.matmul %18, %24, %cst {dimension_numbers = #tpu.dot_dimension_numbers<[2], [1], [1], [2], [0, 0, 0, 1, 1, 2], [0], [0]>} : vector<4x8x32xbf16>, vector<4x32x16xbf16>, vector<4x8x16xf32> -> vector<4x8x16xf32>
    %c0_10 = arith.constant 0 : index
    %c0_11 = arith.constant 0 : index
    %c0_12 = arith.constant 0 : index
    %c0_13 = arith.constant 0 : index
    %c0_14 = arith.constant 0 : index
    %26 = vector.load %arg6[%c0_10, %c0_11, %c0_12, %c0_13, %c0_14] : memref<1x3x4x1x16xf32, #tpu.memory_space<vmem>>, vector<1x1x4x1x16xf32>
    %27 = vector.shape_cast %26 : vector<1x1x4x1x16xf32> to vector<4x1x16xf32>
    %28 = vector.broadcast %27 : vector<4x1x16xf32> to vector<4x8x16xf32>
    %29 = arith.addf %25, %28 : vector<4x8x16xf32>
    %c0_15 = arith.constant 0 : index
    %c1 = arith.constant 1 : index
    %c0_16 = arith.constant 0 : index
    %c0_17 = arith.constant 0 : index
    %c0_18 = arith.constant 0 : index
    %30 = vector.load %arg5[%c0_15, %c1, %c0_16, %c0_17, %c0_18] : memref<1x3x2x32x16xbf16, #tpu.memory_space<vmem>>, vector<1x1x2x32x16xbf16>
    %31 = vector.shape_cast %30 : vector<1x1x2x32x16xbf16> to vector<2x32x16xbf16>
    %32 = vector.shape_cast %31 : vector<2x32x16xbf16> to vector<2x1x32x16xbf16>
    %33 = vector.shape_cast %32 : vector<2x1x32x16xbf16> to vector<2x1x32x16xbf16>
    %34 = vector.broadcast %33 : vector<2x1x32x16xbf16> to vector<2x2x32x16xbf16>
    %35 = vector.shape_cast %34 : vector<2x2x32x16xbf16> to vector<4x32x16xbf16>
    %cst_19 = arith.constant dense<0.000000e+00> : vector<4x8x16xf32>
    %36 = tpu.matmul %18, %35, %cst_19 {dimension_numbers = #tpu.dot_dimension_numbers<[2], [1], [1], [2], [0, 0, 0, 1, 1, 2], [0], [0]>} : vector<4x8x32xbf16>, vector<4x32x16xbf16>, vector<4x8x16xf32> -> vector<4x8x16xf32>
    %c0_20 = arith.constant 0 : index
    %c1_21 = arith.constant 1 : index
    %c0_22 = arith.constant 0 : index
    %c0_23 = arith.constant 0 : index
    %c0_24 = arith.constant 0 : index
    %37 = vector.load %arg6[%c0_20, %c1_21, %c0_22, %c0_23, %c0_24] : memref<1x3x4x1x16xf32, #tpu.memory_space<vmem>>, vector<1x1x4x1x16xf32>
    %38 = vector.shape_cast %37 : vector<1x1x4x1x16xf32> to vector<4x1x16xf32>
    %39 = vector.broadcast %38 : vector<4x1x16xf32> to vector<4x8x16xf32>
    %40 = arith.addf %36, %39 : vector<4x8x16xf32>
    %c0_25 = arith.constant 0 : index
    %c2 = arith.constant 2 : index
    %c0_26 = arith.constant 0 : index
    %c0_27 = arith.constant 0 : index
    %c0_28 = arith.constant 0 : index
    %41 = vector.load %arg5[%c0_25, %c2, %c0_26, %c0_27, %c0_28] : memref<1x3x2x32x16xbf16, #tpu.memory_space<vmem>>, vector<1x1x2x32x16xbf16>
    %42 = vector.shape_cast %41 : vector<1x1x2x32x16xbf16> to vector<2x32x16xbf16>
    %43 = vector.shape_cast %42 : vector<2x32x16xbf16> to vector<2x1x32x16xbf16>
    %44 = vector.shape_cast %43 : vector<2x1x32x16xbf16> to vector<2x1x32x16xbf16>
    %45 = vector.broadcast %44 : vector<2x1x32x16xbf16> to vector<2x2x32x16xbf16>
    %46 = vector.shape_cast %45 : vector<2x2x32x16xbf16> to vector<4x32x16xbf16>
    %cst_29 = arith.constant dense<0.000000e+00> : vector<4x8x16xf32>
    %47 = tpu.matmul %18, %46, %cst_29 {dimension_numbers = #tpu.dot_dimension_numbers<[2], [1], [1], [2], [0, 0, 0, 1, 1, 2], [0], [0]>} : vector<4x8x32xbf16>, vector<4x32x16xbf16>, vector<4x8x16xf32> -> vector<4x8x16xf32>
    %c0_30 = arith.constant 0 : index
    %c2_31 = arith.constant 2 : index
    %c0_32 = arith.constant 0 : index
    %c0_33 = arith.constant 0 : index
    %c0_34 = arith.constant 0 : index
    %48 = vector.load %arg6[%c0_30, %c2_31, %c0_32, %c0_33, %c0_34] : memref<1x3x4x1x16xf32, #tpu.memory_space<vmem>>, vector<1x1x4x1x16xf32>
    %49 = vector.shape_cast %48 : vector<1x1x4x1x16xf32> to vector<4x1x16xf32>
    %50 = vector.broadcast %49 : vector<4x1x16xf32> to vector<4x8x16xf32>
    %51 = arith.addf %47, %50 : vector<4x8x16xf32>
    %52 = arith.truncf %29 : vector<4x8x16xf32> to vector<4x8x16xbf16>
    %53 = arith.truncf %40 : vector<4x8x16xf32> to vector<4x8x16xbf16>
    %cst_35 = arith.constant dense<0.000000e+00> : vector<4x8x8xf32>
    %54 = tpu.matmul %52, %53, %cst_35 {dimension_numbers = #tpu.dot_dimension_numbers<[2], [2], [1], [1], [0, 0, 0, 1, 1, 1], [0], [0]>} : vector<4x8x16xbf16>, vector<4x8x16xbf16>, vector<4x8x8xf32> -> vector<4x8x8xf32>
    %c0_36 = arith.constant 0 : index
    %c0_37 = arith.constant 0 : index
    %c0_38 = arith.constant 0 : index
    %55 = vector.load %arg2[%c0_36, %c0_37, %c0_38] : memref<4x1x8xf32, #tpu.memory_space<vmem>>, vector<4x1x8xf32>
    %56 = vector.broadcast %55 : vector<4x1x8xf32> to vector<4x8x8xf32>
    %57 = arith.addf %54, %56 : vector<4x8x8xf32>
    %cst_39 = arith.constant dense<0xFF800000> : vector<4x8xf32>
    %58 = vector.multi_reduction <maximumf>, %57, %cst_39 [2] : vector<4x8x8xf32> to vector<4x8xf32>
    %59 = vector.shape_cast %58 : vector<4x8xf32> to vector<4x8x1xf32>
    %60 = vector.broadcast %59 : vector<4x8x1xf32> to vector<4x8x8xf32>
    %61 = arith.subf %57, %60 : vector<4x8x8xf32>
    %62 = math.exp %61 : vector<4x8x8xf32>
    %cst_40 = arith.constant dense<0.000000e+00> : vector<4x8xf32>
    %63 = vector.multi_reduction <add>, %62, %cst_40 [2] : vector<4x8x8xf32> to vector<4x8xf32>
    %64 = vector.shape_cast %63 : vector<4x8xf32> to vector<4x8x1xf32>
    %65 = vector.broadcast %64 : vector<4x8x1xf32> to vector<4x8x8xf32>
    %66 = arith.divf %62, %65 : vector<4x8x8xf32>
    %67 = arith.truncf %66 : vector<4x8x8xf32> to vector<4x8x8xbf16>
    %68 = arith.truncf %51 : vector<4x8x16xf32> to vector<4x8x16xbf16>
    %cst_41 = arith.constant dense<0.000000e+00> : vector<4x8x16xf32>
    %69 = tpu.matmul %67, %68, %cst_41 {dimension_numbers = #tpu.dot_dimension_numbers<[2], [1], [1], [2], [0, 0, 0, 1, 1, 2], [0], [0]>} : vector<4x8x8xbf16>, vector<4x8x16xbf16>, vector<4x8x16xf32> -> vector<4x8x16xf32>
    %c0_42 = arith.constant 0 : index
    %c0_43 = arith.constant 0 : index
    %c0_44 = arith.constant 0 : index
    %c0_45 = arith.constant 0 : index
    %70 = vector.load %arg7[%c0_42, %c0_43, %c0_44, %c0_45] : memref<1x2x16x32xbf16, #tpu.memory_space<vmem>>, vector<1x2x16x32xbf16>
    %71 = vector.shape_cast %70 : vector<1x2x16x32xbf16> to vector<2x16x32xbf16>
    %72 = vector.shape_cast %71 : vector<2x16x32xbf16> to vector<2x1x16x32xbf16>
    %73 = vector.shape_cast %72 : vector<2x1x16x32xbf16> to vector<2x1x16x32xbf16>
    %74 = vector.broadcast %73 : vector<2x1x16x32xbf16> to vector<2x2x16x32xbf16>
    %75 = vector.shape_cast %74 : vector<2x2x16x32xbf16> to vector<4x16x32xbf16>
    %76 = arith.truncf %69 : vector<4x8x16xf32> to vector<4x8x16xbf16>
    %cst_46 = arith.constant dense<0.000000e+00> : vector<4x8x32xf32>
    %77 = tpu.matmul %76, %75, %cst_46 {dimension_numbers = #tpu.dot_dimension_numbers<[2], [1], [1], [2], [0, 0, 0, 1, 1, 2], [0], [0]>} : vector<4x8x16xbf16>, vector<4x16x32xbf16>, vector<4x8x32xf32> -> vector<4x8x32xf32>
    %78 = vector.shape_cast %77 : vector<4x8x32xf32> to vector<2x16x32xf32>
    %cst_47 = arith.constant dense<0.000000e+00> : vector<16x32xf32>
    %79 = vector.multi_reduction <add>, %78, %cst_47 [0] : vector<2x16x32xf32> to vector<16x32xf32>
    %80 = vector.broadcast %6 : vector<1x32xf32> to vector<16x32xf32>
    %81 = arith.addf %79, %80 : vector<16x32xf32>
    %82 = arith.addf %81, %3 : vector<16x32xf32>
    %cst_48 = arith.constant dense<0.000000e+00> : vector<16xf32>
    %83 = vector.multi_reduction <add>, %82, %cst_48 [1] : vector<16x32xf32> to vector<16xf32>
    %84 = vector.shape_cast %83 : vector<16xf32> to vector<16x1xf32>
    %cst_49 = arith.constant 3.200000e+01 : f32
    %85 = vector.broadcast %cst_49 : f32 to vector<16x1xf32>
    %86 = arith.divf %84, %85 : vector<16x1xf32>
    %87 = vector.broadcast %86 : vector<16x1xf32> to vector<16x32xf32>
    %88 = arith.subf %82, %87 : vector<16x32xf32>
    %89 = arith.mulf %88, %88 : vector<16x32xf32>
    %cst_50 = arith.constant dense<0.000000e+00> : vector<16xf32>
    %90 = vector.multi_reduction <add>, %89, %cst_50 [1] : vector<16x32xf32> to vector<16xf32>
    %91 = vector.shape_cast %90 : vector<16xf32> to vector<16x1xf32>
    %cst_51 = arith.constant 3.200000e+01 : f32
    %92 = vector.broadcast %cst_51 : f32 to vector<16x1xf32>
    %93 = arith.divf %91, %92 : vector<16x1xf32>
    %94 = vector.broadcast %86 : vector<16x1xf32> to vector<16x32xf32>
    %95 = arith.subf %82, %94 : vector<16x32xf32>
    %cst_52 = arith.constant 9.99999996E-13 : f32
    %96 = vector.broadcast %cst_52 : f32 to vector<16x1xf32>
    %97 = arith.addf %93, %96 : vector<16x1xf32>
    %98 = math.rsqrt %97 : vector<16x1xf32>
    %99 = vector.broadcast %98 : vector<16x1xf32> to vector<16x32xf32>
    %100 = arith.mulf %95, %99 : vector<16x32xf32>
    %101 = vector.broadcast %7 : vector<1x32xf32> to vector<16x32xf32>
    %102 = arith.mulf %100, %101 : vector<16x32xf32>
    %103 = vector.broadcast %8 : vector<1x32xf32> to vector<16x32xf32>
    %104 = arith.addf %102, %103 : vector<16x32xf32>
    %c0_53 = arith.constant 0 : index
    %c0_54 = arith.constant 0 : index
    %c0_55 = arith.constant 0 : index
    %105 = vector.load %arg8[%c0_53, %c0_54, %c0_55] : memref<1x32x64xbf16, #tpu.memory_space<vmem>>, vector<1x32x64xbf16>
    %106 = vector.shape_cast %105 : vector<1x32x64xbf16> to vector<32x64xbf16>
    %107 = arith.truncf %104 : vector<16x32xf32> to vector<16x32xbf16>
    %cst_56 = arith.constant dense<0.000000e+00> : vector<16x64xf32>
    %108 = tpu.matmul %107, %106, %cst_56 {dimension_numbers = #tpu.dot_dimension_numbers<[1], [0], [0], [1], [0, 0, 1, 1], [], []>} : vector<16x32xbf16>, vector<32x64xbf16>, vector<16x64xf32> -> vector<16x64xf32>
    %109 = vector.broadcast %9 : vector<1x64xf32> to vector<16x64xf32>
    %110 = arith.addf %108, %109 : vector<16x64xf32>
    %cst_57 = arith.constant 5.000000e-01 : f32
    %111 = vector.broadcast %cst_57 : f32 to vector<16x64xf32>
    %112 = arith.mulf %111, %110 : vector<16x64xf32>
    %cst_58 = arith.constant 4.471500e-02 : f32
    %113 = vector.broadcast %cst_58 : f32 to vector<16x64xf32>
    %114 = arith.mulf %113, %110 : vector<16x64xf32>
    %115 = arith.mulf %114, %110 : vector<16x64xf32>
    %116 = arith.mulf %115, %110 : vector<16x64xf32>
    %117 = arith.addf %110, %116 : vector<16x64xf32>
    %cst_59 = arith.constant 0.797884583 : f32
    %118 = vector.broadcast %cst_59 : f32 to vector<16x64xf32>
    %119 = arith.mulf %118, %117 : vector<16x64xf32>
    %120 = math.tanh %119 : vector<16x64xf32>
    %cst_60 = arith.constant 1.000000e+00 : f32
    %121 = vector.broadcast %cst_60 : f32 to vector<16x64xf32>
    %122 = arith.addf %121, %120 : vector<16x64xf32>
    %123 = arith.mulf %112, %122 : vector<16x64xf32>
    %c0_61 = arith.constant 0 : index
    %c0_62 = arith.constant 0 : index
    %c0_63 = arith.constant 0 : index
    %124 = vector.load %arg9[%c0_61, %c0_62, %c0_63] : memref<1x64x32xbf16, #tpu.memory_space<vmem>>, vector<1x64x32xbf16>
    %125 = vector.shape_cast %124 : vector<1x64x32xbf16> to vector<64x32xbf16>
    %126 = arith.truncf %123 : vector<16x64xf32> to vector<16x64xbf16>
    %cst_64 = arith.constant dense<0.000000e+00> : vector<16x32xf32>
    %127 = tpu.matmul %126, %125, %cst_64 {dimension_numbers = #tpu.dot_dimension_numbers<[1], [0], [0], [1], [0, 0, 1, 1], [], []>} : vector<16x64xbf16>, vector<64x32xbf16>, vector<16x32xf32> -> vector<16x32xf32>
    %128 = vector.broadcast %10 : vector<1x32xf32> to vector<16x32xf32>
    %129 = arith.addf %127, %128 : vector<16x32xf32>
    %130 = arith.addf %129, %104 : vector<16x32xf32>
    %cst_65 = arith.constant dense<0.000000e+00> : vector<16xf32>
    %131 = vector.multi_reduction <add>, %130, %cst_65 [1] : vector<16x32xf32> to vector<16xf32>
    %132 = vector.shape_cast %131 : vector<16xf32> to vector<16x1xf32>
    %cst_66 = arith.constant 3.200000e+01 : f32
    %133 = vector.broadcast %cst_66 : f32 to vector<16x1xf32>
    %134 = arith.divf %132, %133 : vector<16x1xf32>
    %135 = vector.broadcast %134 : vector<16x1xf32> to vector<16x32xf32>
    %136 = arith.subf %130, %135 : vector<16x32xf32>
    %137 = arith.mulf %136, %136 : vector<16x32xf32>
    %cst_67 = arith.constant dense<0.000000e+00> : vector<16xf32>
    %138 = vector.multi_reduction <add>, %137, %cst_67 [1] : vector<16x32xf32> to vector<16xf32>
    %139 = vector.shape_cast %138 : vector<16xf32> to vector<16x1xf32>
    %cst_68 = arith.constant 3.200000e+01 : f32
    %140 = vector.broadcast %cst_68 : f32 to vector<16x1xf32>
    %141 = arith.divf %139, %140 : vector<16x1xf32>
    %142 = vector.broadcast %134 : vector<16x1xf32> to vector<16x32xf32>
    %143 = arith.subf %130, %142 : vector<16x32xf32>
    %cst_69 = arith.constant 9.99999996E-13 : f32
    %144 = vector.broadcast %cst_69 : f32 to vector<16x1xf32>
    %145 = arith.addf %141, %144 : vector<16x1xf32>
    %146 = math.rsqrt %145 : vector<16x1xf32>
    %147 = vector.broadcast %146 : vector<16x1xf32> to vector<16x32xf32>
    %148 = arith.mulf %143, %147 : vector<16x32xf32>
    %149 = vector.broadcast %11 : vector<1x32xf32> to vector<16x32xf32>
    %150 = arith.mulf %148, %149 : vector<16x32xf32>
    %151 = vector.broadcast %12 : vector<1x32xf32> to vector<16x32xf32>
    %152 = arith.addf %150, %151 : vector<16x32xf32>
    %c0_70 = arith.constant 0 : index
    %c0_71 = arith.constant 0 : index
    %153 = vector.load %arg16[%c0_70, %c0_71] : memref<16x32xf32, #tpu.memory_space<vmem>>, vector<16x32xf32>
    tpu.vector_store %arg16[%c0_70, %c0_71], %152 {strides = array<i32>} : memref<16x32xf32, #tpu.memory_space<vmem>>, vector<16x32xf32>,
    %c1_i32 = arith.constant 1 : i32
    %154 = arith.cmpi eq, %arg0, %c1_i32 : i32
    %155 = arith.extui %154 : i1 to i32
    %c0_i32_72 = arith.constant 0 : i32
    %156 = arith.cmpi ne, %155, %c0_i32_72 : i32
    scf.if %156 {
      %c0_73 = arith.constant 0 : index
      %c0_74 = arith.constant 0 : index
      %157 = vector.load %arg13[%c0_73, %c0_74] : memref<16x32xf32, #tpu.memory_space<vmem>>, vector<16x32xf32>
      tpu.vector_store %arg13[%c0_73, %c0_74], %152 {strides = array<i32>} : memref<16x32xf32, #tpu.memory_space<vmem>>, vector<16x32xf32>,
      %c0_75 = arith.constant 0 : index
      %c0_76 = arith.constant 0 : index
      %158 = memref.load %arg1[%c0_75, %c0_76] : memref<2x8xi32, #tpu.memory_space<smem>>
      %c1_77 = arith.constant 1 : index
      %c0_78 = arith.constant 0 : index
      %159 = memref.load %arg1[%c1_77, %c0_78] : memref<2x8xi32, #tpu.memory_space<smem>>
      %160 = arith.index_cast %158 : i32 to index
      %c0_79 = arith.constant 0 : index
      %161 = vector.load %arg16[%160, %c0_79] : memref<16x32xf32, #tpu.memory_space<vmem>>, vector<1x32xf32>
      %162 = arith.index_cast %159 : i32 to index
      %c0_80 = arith.constant 0 : index
      %163 = vector.load %arg16[%162, %c0_80] : memref<16x32xf32, #tpu.memory_space<vmem>>, vector<1x32xf32>
      %164 = arith.addf %161, %163 : vector<1x32xf32>
      %c0_81 = arith.constant 0 : index
      %c1_82 = arith.constant 1 : index
      %165 = memref.load %arg1[%c0_81, %c1_82] : memref<2x8xi32, #tpu.memory_space<smem>>
      %c1_83 = arith.constant 1 : index
      %c1_84 = arith.constant 1 : index
      %166 = memref.load %arg1[%c1_83, %c1_84] : memref<2x8xi32, #tpu.memory_space<smem>>
      %167 = arith.index_cast %165 : i32 to index
      %c0_85 = arith.constant 0 : index
      %168 = vector.load %arg16[%167, %c0_85] : memref<16x32xf32, #tpu.memory_space<vmem>>, vector<1x32xf32>
      %169 = arith.index_cast %166 : i32 to index
      %c0_86 = arith.constant 0 : index
      %170 = vector.load %arg16[%169, %c0_86] : memref<16x32xf32, #tpu.memory_space<vmem>>, vector<1x32xf32>
      %171 = arith.addf %168, %170 : vector<1x32xf32>
      %c0_87 = arith.constant 0 : index
      %c2_88 = arith.constant 2 : index
      %172 = memref.load %arg1[%c0_87, %c2_88] : memref<2x8xi32, #tpu.memory_space<smem>>
      %c1_89 = arith.constant 1 : index
      %c2_90 = arith.constant 2 : index
      %173 = memref.load %arg1[%c1_89, %c2_90] : memref<2x8xi32, #tpu.memory_space<smem>>
      %174 = arith.index_cast %172 : i32 to index
      %c0_91 = arith.constant 0 : index
      %175 = vector.load %arg16[%174, %c0_91] : memref<16x32xf32, #tpu.memory_space<vmem>>, vector<1x32xf32>
      %176 = arith.index_cast %173 : i32 to index
      %c0_92 = arith.constant 0 : index
      %177 = vector.load %arg16[%176, %c0_92] : memref<16x32xf32, #tpu.memory_space<vmem>>, vector<1x32xf32>
      %178 = arith.addf %175, %177 : vector<1x32xf32>
      %c0_93 = arith.constant 0 : index
      %c3 = arith.constant 3 : index
      %179 = memref.load %arg1[%c0_93, %c3] : memref<2x8xi32, #tpu.memory_space<smem>>
      %c1_94 = arith.constant 1 : index
      %c3_95 = arith.constant 3 : index
      %180 = memref.load %arg1[%c1_94, %c3_95] : memref<2x8xi32, #tpu.memory_space<smem>>
      %181 = arith.index_cast %179 : i32 to index
      %c0_96 = arith.constant 0 : index
      %182 = vector.load %arg16[%181, %c0_96] : memref<16x32xf32, #tpu.memory_space<vmem>>, vector<1x32xf32>
      %183 = arith.index_cast %180 : i32 to index
      %c0_97 = arith.constant 0 : index
      %184 = vector.load %arg16[%183, %c0_97] : memref<16x32xf32, #tpu.memory_space<vmem>>, vector<1x32xf32>
      %185 = arith.addf %182, %184 : vector<1x32xf32>
      %c0_98 = arith.constant 0 : index
      %c4 = arith.constant 4 : index
      %186 = memref.load %arg1[%c0_98, %c4] : memref<2x8xi32, #tpu.memory_space<smem>>
      %c1_99 = arith.constant 1 : index
      %c4_100 = arith.constant 4 : index
      %187 = memref.load %arg1[%c1_99, %c4_100] : memref<2x8xi32, #tpu.memory_space<smem>>
      %188 = arith.index_cast %186 : i32 to index
      %c0_101 = arith.constant 0 : index
      %189 = vector.load %arg16[%188, %c0_101] : memref<16x32xf32, #tpu.memory_space<vmem>>, vector<1x32xf32>
      %190 = arith.index_cast %187 : i32 to index
      %c0_102 = arith.constant 0 : index
      %191 = vector.load %arg16[%190, %c0_102] : memref<16x32xf32, #tpu.memory_space<vmem>>, vector<1x32xf32>
      %192 = arith.addf %189, %191 : vector<1x32xf32>
      %c0_103 = arith.constant 0 : index
      %c5 = arith.constant 5 : index
      %193 = memref.load %arg1[%c0_103, %c5] : memref<2x8xi32, #tpu.memory_space<smem>>
      %c1_104 = arith.constant 1 : index
      %c5_105 = arith.constant 5 : index
      %194 = memref.load %arg1[%c1_104, %c5_105] : memref<2x8xi32, #tpu.memory_space<smem>>
      %195 = arith.index_cast %193 : i32 to index
      %c0_106 = arith.constant 0 : index
      %196 = vector.load %arg16[%195, %c0_106] : memref<16x32xf32, #tpu.memory_space<vmem>>, vector<1x32xf32>
      %197 = arith.index_cast %194 : i32 to index
      %c0_107 = arith.constant 0 : index
      %198 = vector.load %arg16[%197, %c0_107] : memref<16x32xf32, #tpu.memory_space<vmem>>, vector<1x32xf32>
      %199 = arith.addf %196, %198 : vector<1x32xf32>
      %c0_108 = arith.constant 0 : index
      %c6 = arith.constant 6 : index
      %200 = memref.load %arg1[%c0_108, %c6] : memref<2x8xi32, #tpu.memory_space<smem>>
      %c1_109 = arith.constant 1 : index
      %c6_110 = arith.constant 6 : index
      %201 = memref.load %arg1[%c1_109, %c6_110] : memref<2x8xi32, #tpu.memory_space<smem>>
      %202 = arith.index_cast %200 : i32 to index
      %c0_111 = arith.constant 0 : index
      %203 = vector.load %arg16[%202, %c0_111] : memref<16x32xf32, #tpu.memory_space<vmem>>, vector<1x32xf32>
      %204 = arith.index_cast %201 : i32 to index
      %c0_112 = arith.constant 0 : index
      %205 = vector.load %arg16[%204, %c0_112] : memref<16x32xf32, #tpu.memory_space<vmem>>, vector<1x32xf32>
      %206 = arith.addf %203, %205 : vector<1x32xf32>
      %c0_113 = arith.constant 0 : index
      %c7 = arith.constant 7 : index
      %207 = memref.load %arg1[%c0_113, %c7] : memref<2x8xi32, #tpu.memory_space<smem>>
      %c1_114 = arith.constant 1 : index
      %c7_115 = arith.constant 7 : index
      %208 = memref.load %arg1[%c1_114, %c7_115] : memref<2x8xi32, #tpu.memory_space<smem>>
      %209 = arith.index_cast %207 : i32 to index
      %c0_116 = arith.constant 0 : index
      %210 = vector.load %arg16[%209, %c0_116] : memref<16x32xf32, #tpu.memory_space<vmem>>, vector<1x32xf32>
      %211 = arith.index_cast %208 : i32 to index
      %c0_117 = arith.constant 0 : index
      %212 = vector.load %arg16[%211, %c0_117] : memref<16x32xf32, #tpu.memory_space<vmem>>, vector<1x32xf32>
      %213 = arith.addf %210, %212 : vector<1x32xf32>
      %214 = tpu.concatenate %164, %171, %178, %185, %192, %199, %206, %213 in 0 : vector<1x32xf32>, vector<1x32xf32>, vector<1x32xf32>, vector<1x32xf32>, vector<1x32xf32>, vector<1x32xf32>, vector<1x32xf32>, vector<1x32xf32> -> vector<8x32xf32>
      %c0_118 = arith.constant 0 : index
      %c0_119 = arith.constant 0 : index
      %215 = vector.load %arg14[%c0_118, %c0_119] : memref<8x32xf32, #tpu.memory_space<vmem>>, vector<8x32xf32>
      tpu.vector_store %arg14[%c0_118, %c0_119], %214 {strides = array<i32>} : memref<8x32xf32, #tpu.memory_space<vmem>>, vector<8x32xf32>,
      %c0_120 = arith.constant 0 : index
      %c0_121 = arith.constant 0 : index
      %216 = vector.load %arg11[%c0_120, %c0_121] : memref<32x128xf32, #tpu.memory_space<vmem>>, vector<32x128xf32>
      %cst_122 = arith.constant dense<0.000000e+00> : vector<8x128xf32>
      %217 = tpu.matmul %214, %216, %cst_122 {dimension_numbers = #tpu.dot_dimension_numbers<[1], [0], [0], [1], [0, 0, 1, 1], [], []>} : vector<8x32xf32>, vector<32x128xf32>, vector<8x128xf32> -> vector<8x128xf32>
      %c0_123 = arith.constant 0 : index
      %c0_124 = arith.constant 0 : index
      %218 = vector.load %arg12[%c0_123, %c0_124] : memref<1x128xf32, #tpu.memory_space<vmem>>, vector<1x128xf32>
      %219 = vector.broadcast %218 : vector<1x128xf32> to vector<8x128xf32>
      %220 = arith.addf %217, %219 : vector<8x128xf32>
      %c0_125 = arith.constant 0 : index
      %c0_126 = arith.constant 0 : index
      %221 = vector.load %arg15[%c0_125, %c0_126] : memref<8x128xf32, #tpu.memory_space<vmem>>, vector<8x128xf32>
      tpu.vector_store %arg15[%c0_125, %c0_126], %220 {strides = array<i32>} : memref<8x128xf32, #tpu.memory_space<vmem>>, vector<8x128xf32>,
    } else {
    }
    return
  }
  func.func @transform_0(%arg0: i32, %arg1: memref<2x8xi32, #tpu.memory_space<smem>>) -> (i32, i32, i32) {
    %c0_i32 = arith.constant 0 : i32
    %c0_i32_0 = arith.constant 0 : i32
    %c0_i32_1 = arith.constant 0 : i32
    %c0_i32_2 = arith.constant 0 : i32
    return %c0_i32, %c0_i32_0, %c0_i32_1 : i32, i32, i32
  }
  func.func @transform_1(%arg0: i32, %arg1: memref<2x8xi32, #tpu.memory_space<smem>>) -> (i32, i32) {
    %c0_i32 = arith.constant 0 : i32
    %c0_i32_0 = arith.constant 0 : i32
    %c0_i32_1 = arith.constant 0 : i32
    return %c0_i32, %c0_i32_0 : i32, i32
  }
  func.func @transform_2(%arg0: i32, %arg1: memref<2x8xi32, #tpu.memory_space<smem>>) -> (i32, i32) {
    %c0_i32 = arith.constant 0 : i32
    %c0_i32_0 = arith.constant 0 : i32
    %c0_i32_1 = arith.constant 0 : i32
    return %c0_i32, %c0_i32_0 : i32, i32
  }
  func.func @transform_3(%arg0: i32, %arg1: memref<2x8xi32, #tpu.memory_space<smem>>) -> (i32, i32, i32, i32, i32) {
    %c0_i32 = arith.constant 0 : i32
    %c0_i32_0 = arith.constant 0 : i32
    %c0_i32_1 = arith.constant 0 : i32
    %c0_i32_2 = arith.constant 0 : i32
    %c0_i32_3 = arith.constant 0 : i32
    return %arg0, %c0_i32, %c0_i32_0, %c0_i32_1, %c0_i32_2 : i32, i32, i32, i32, i32
  }
  func.func @transform_4(%arg0: i32, %arg1: memref<2x8xi32, #tpu.memory_space<smem>>) -> (i32, i32, i32, i32, i32) {
    %c0_i32 = arith.constant 0 : i32
    %c0_i32_0 = arith.constant 0 : i32
    %c0_i32_1 = arith.constant 0 : i32
    %c0_i32_2 = arith.constant 0 : i32
    %c0_i32_3 = arith.constant 0 : i32
    return %arg0, %c0_i32, %c0_i32_0, %c0_i32_1, %c0_i32_2 : i32, i32, i32, i32, i32
  }
  func.func @transform_5(%arg0: i32, %arg1: memref<2x8xi32, #tpu.memory_space<smem>>) -> (i32, i32, i32, i32) {
    %c0_i32 = arith.constant 0 : i32
    %c0_i32_0 = arith.constant 0 : i32
    %c0_i32_1 = arith.constant 0 : i32
    %c0_i32_2 = arith.constant 0 : i32
    return %arg0, %c0_i32, %c0_i32_0, %c0_i32_1 : i32, i32, i32, i32
  }
  func.func @transform_6(%arg0: i32, %arg1: memref<2x8xi32, #tpu.memory_space<smem>>) -> (i32, i32, i32) {
    %c0_i32 = arith.constant 0 : i32
    %c0_i32_0 = arith.constant 0 : i32
    %c0_i32_1 = arith.constant 0 : i32
    return %arg0, %c0_i32, %c0_i32_0 : i32, i32, i32
  }
  func.func @transform_7(%arg0: i32, %arg1: memref<2x8xi32, #tpu.memory_space<smem>>) -> (i32, i32, i32) {
    %c0_i32 = arith.constant 0 : i32
    %c0_i32_0 = arith.constant 0 : i32
    %c0_i32_1 = arith.constant 0 : i32
    return %arg0, %c0_i32, %c0_i32_0 : i32, i32, i32
  }
  func.func @transform_8(%arg0: i32, %arg1: memref<2x8xi32, #tpu.memory_space<smem>>) -> (i32, i32, i32) {
    %c0_i32 = arith.constant 0 : i32
    %c0_i32_0 = arith.constant 0 : i32
    %c0_i32_1 = arith.constant 0 : i32
    return %arg0, %c0_i32, %c0_i32_0 : i32, i32, i32
  }
  func.func @transform_9(%arg0: i32, %arg1: memref<2x8xi32, #tpu.memory_space<smem>>) -> (i32, i32) {
    %c0_i32 = arith.constant 0 : i32
    %c0_i32_0 = arith.constant 0 : i32
    %c0_i32_1 = arith.constant 0 : i32
    return %c0_i32, %c0_i32_0 : i32, i32
  }
  func.func @transform_10(%arg0: i32, %arg1: memref<2x8xi32, #tpu.memory_space<smem>>) -> (i32, i32) {
    %c0_i32 = arith.constant 0 : i32
    %c0_i32_0 = arith.constant 0 : i32
    %c0_i32_1 = arith.constant 0 : i32
    return %c0_i32, %c0_i32_0 : i32, i32
  }
  func.func @transform_11(%arg0: i32, %arg1: memref<2x8xi32, #tpu.memory_space<smem>>) -> (i32, i32) {
    %c0_i32 = arith.constant 0 : i32
    %c0_i32_0 = arith.constant 0 : i32
    %c0_i32_1 = arith.constant 0 : i32
    return %c0_i32, %c0_i32_0 : i32, i32
  }
  func.func @transform_12(%arg0: i32, %arg1: memref<2x8xi32, #tpu.memory_space<smem>>) -> (i32, i32) {
    %c0_i32 = arith.constant 0 : i32
    %c0_i32_0 = arith.constant 0 : i32
    %c0_i32_1 = arith.constant 0 : i32
    return %c0_i32, %c0_i32_0 : i32, i32
  }
  func.func @transform_13(%arg0: i32, %arg1: memref<2x8xi32, #tpu.memory_space<smem>>) -> (i32, i32) {
    %c0_i32 = arith.constant 0 : i32
    %c0_i32_0 = arith.constant 0 : i32
    %c0_i32_1 = arith.constant 0 : i32
    return %c0_i32, %c0_i32_0 : i32, i32
  }
}

</mosaic_0001>

<bundles_post_ra>
// kernel: tpu_custom_call.1
= control target key start
LH: loop header
LB: loop body
LE: loop exit
PB: predicated region body
PF: predicated region fallthrough
CT: control target
= control target key end

     0   :  { %s3610_s0 = inlined_call_operand.vmem [shape: s32[2,8], index: 0, kind: input, shape index: {}]   ;;  %s3611_s1 = inlined_call_operand.vmem [shape: f32[4,1,8], index: 1, kind: input, shape index: {}]   ;;  %s3612_s2 = inlined_call_operand.vmem [shape: f32[16,32], index: 2, kind: input, shape index: {}]   ;;  %s3613_s3 = inlined_call_operand.vmem [shape: f32[2,32], index: 3, kind: input, shape index: {}]   ;;  %s3614_s4 = inlined_call_operand.vmem [shape: bf16[2,3,2,32,16], index: 4, kind: input, shape index: {}]   ;;  %s3615_s5 = inlined_call_operand.vmem [shape: f32[2,3,4,1,16], index: 5, kind: input, shape index: {}]   ;;  %s3616_s6 = inlined_call_operand.vmem [shape: bf16[2,2,16,32], index: 6, kind: input, shape index: {}]   ;;  %s3617_s7 = inlined_call_operand.vmem [shape: bf16[2,32,64], index: 7, kind: input, shape index: {}]   ;;  %s3618_s8 = inlined_call_operand.vmem [shape: bf16[2,64,32], index: 8, kind: input, shape index: {}]   ;;  %s3619_s9 = inlined_call_operand.vmem [shape: f32[2,7,64], index: 9, kind: input, shape index: {}]   ;;  %s3620_s10 = inlined_call_operand.vmem [shape: f32[32,128], index: 10, kind: input, shape index: {}]   ;;  %s3621_s11 = inlined_call_operand.vmem [shape: f32[1,128], index: 11, kind: input, shape index: {}]   ;;  %s3622_s12 = inlined_call_operand.hbm [shape: f32[16,32], index: 12, kind: output, shape index: {0}]   ;;  %s3623_s13 = inlined_call_operand.hbm [shape: f32[8,32], index: 13, kind: output, shape index: {1}]   ;;  %s3624_s14 = inlined_call_operand.hbm [shape: f32[8,128], index: 14, kind: output, shape index: {2}]  }
   0x1   :  { %3628 = sst [smem:[#allocation14_spill]] %s3611_s1  ;;  %s20_s15 = sshll.u32 %s3610_s0, 4  ;;  %s21_s15 = int_to_ptr.vmem [resolvable:$true] %s20_s15 }
   0x2   :  { %3629 = sst [smem:[#allocation15_spill]] %s3616_s6  ;;  %s3010_s16 = scalar_lea.vmem %s21_s15, 32 }
   0x3   :  { %3630 = sst [smem:[#allocation16_spill]] %s3622_s12  ;;  %p3011_p0 = scmp.ne.s32.totalorder %s21_s15, %s3010_s16 }
   0x4   :  { %3631 = sst [smem:[#allocation17_spill]] %s3624_s14  ;;  %p3015_p1 = scmp.lt.s32.totalorder %s21_s15, %s21_s15 }
   0x5   :  { %p3016_p2 = scmp.lt.s32.totalorder %s3010_s16, %s3010_s16 }
   0x7   :  { %p3017_p3 = por %p3016_p2, %p3015_p1 }
   0x9   :  { %p3018_p4 = pnand %p3017_p3, %p3011_p0 }
   0xb   :  { %3021 = shalt.err (!%p3018_p4)  }
   0xc   :  { %s3118_s17 = smov [#allocation4]  }
   0xd   :  { %23 = dma.vmem_to_smem %s21_s15, 32, %s3118_s17, [#allocation3] }
   0xe   :  { %3104 = dma.done.wait [#allocation3], 32 }
   0xf   :  { %3105 = vsyncadd [#allocation3], 4294967264 }
  0x10   :  { %25 = sfence }
  0x11   :  { %26 = vsyncpa [#allocation6], 0 }
  0x12   :  { %27 = vsyncpa [#allocation8], 0  ;;  %s3207_s18 = smov 0  }
  0x13 LB: > { %3632 = sst [smem:[#allocation13_spill]] %s3116_s18  ;;  %s3213_s0 = sadd.s32 4294967295, %s3116_s18   ;;  %s3116_s18 = sphi %s3207_s18, %s33_s18  }
  0x14   : > { %p2514_p5 = scmp.ge.s32.totalorder %s3116_s18, 1  ;;  %p434_p6 = scmp.lt.s32.totalorder %s3116_s18, 3 }
  0x16   : > { %p435_p7 = pnand %p2514_p5, %p434_p6 }
  0x17   : > { %p496_p8 = scmp.lt.s32.totalorder (!%p435_p7), %s3213_s0, 1  ;;  %s3633_s6 = sld [smem:[#allocation15_spill]] (!%p435_p7) }
  0x18   : > { %438 = sbr.rel (%p435_p7) target bundleno = 2991 (0xbaf), region = 64  ;;  %p2523_p9 = scmp.ne.s32.totalorder (!%p435_p7), %s3213_s0, 0 }
  0x1f   : > { %s497_s19 = scalar_select %p496_p8, %s3213_s0, 1 }
  0x20   : > { %528 = sbr.rel (%p2523_p9) target bundleno = 351 (0x15f), region = 68  ;;  %v529_v0 = vld [vmem:[%s3612_s2] sm:$0xff] (!%p2523_p9)  ;;  %vm533_vm0 = vcmask (!%p2523_p9), 261120   ;;  %v530_v1 = vld [vmem:[%s3612_s2 + $0x8] sm:$0xff] (!%p2523_p9) }
  0x21   : > { %s2919_s20 = smul.u32 96, %s497_s19  ;;  %s2638_s21 = sshll.u32 %s497_s19, 4  ;;  %v534_v2 = vsel (!%p2523_p9), %vm533_vm0, %v529_v0, 0.0  ;;  %v537_v3 = vsel (!%p2523_p9), %vm533_vm0, %v530_v1, 0.0  ;;  %v2524_v21 = vld [vmem:[%s3613_s3] ss:$0 sm:$0xff] (!%p2523_p9) }
  0x22   : > { %s2920_s22 = smul.u32 12, %s497_s19  ;;  %s3222_s25 = scalar_lea.vmem %s3633_s6, %s2638_s21  ;;  %535 = vadd.xlane.f32.xlu0 (!%p2523_p9), %v534_v2  ;;  %v2525_v23 = vld [vmem:[%s3613_s3 + $0x1] ss:$0 sm:$0xff] (!%p2523_p9) }
  0x23   : > { %s3227_s28 = scalar_lea.vmem %s3614_s4, %s2919_s20  ;;  %s3232_s15 = scalar_lea.vmem %s3617_s7, %s2638_s21 }
  0x24   : > { %s3237_s18 = scalar_lea.vmem %s3615_s5, %s2920_s22  ;;  %s2640_s14 = sshll.u32 %s497_s19, 5 }
  0x25   : > { %s3242_s24 = scalar_lea.vmem %s3618_s8, %s2640_s14  ;;  %s2522_s6 = sshll.u32 %s497_s19, 3 }
  0x26   : > { %s3247_s27 = scalar_lea.vmem %s3619_s9, %s2522_s6  ;;  %538 = vadd.xlane.f32.xlu0 (!%p2523_p9), %v537_v3 }
  0xaf   : > { %v536_v4 = vpop.xlane.xlu0 %535 }
  0xb0   : > { %v541_v5 = vmul.f32 0.03125, %v536_v4 }
  0xb2   : > { %v543_v6 = vsub.f32 %v529_v0, %v541_v5 }
  0xb3   : > { %v539_v7 = vpop.xlane.xlu0 %538 }
  0xb4   : > { %v542_v8 = vmul.f32 0.03125, %v539_v7  ;;  %v545_v9 = vmul.f32 %v543_v6, %v543_v6 }
  0xb6   : > { %v544_v10 = vsub.f32 %v530_v1, %v542_v8  ;;  %v547_v11 = vsel %vm533_vm0, %v545_v9, 0.0 }
  0xb7   : > { %548 = vadd.xlane.f32.xlu1 %v547_v11 }
  0xb8   : > { %v546_v12 = vmul.f32 %v544_v10, %v544_v10 }
  0xba   : > { %v550_v13 = vsel %vm533_vm0, %v546_v12, 0.0 }
  0xbb   : > { %551 = vadd.xlane.f32.xlu1 %v550_v13 }
 0x144   : > { %v549_v14 = vpop.xlane.xlu1 %548 }
 0x145   : > { %v553_v15 = vmul.f32 0.03125, %v549_v14 }
 0x147   : > { %v555_v16 = vadd.f32 1e-12, %v553_v15 }
 0x148   : > { %v552_v17 = vpop.xlane.xlu1 %551 }
 0x149   : > { %2958 = vrsqrt.f32 %v555_v16  ;;  %v554_v18 = vmul.f32 0.03125, %v552_v17 }
 0x14b   : > { %v556_v19 = vadd.f32 1e-12, %v554_v18 }
 0x14d   : > { %2960 = vrsqrt.f32 %v556_v19 }
 0x153   : > { %v2959_v20 = vpop.eup %2958 }
 0x154   : > { %v559_v22 = vmul.f32 %v2959_v20, %v543_v6 }
 0x156   : > { %v565_v24 = vmul.f32 %v2524_v21, %v559_v22 }
 0x157   : > { %v2961_v25 = vpop.eup %2960 }
 0x158   : > { %v571_v26 = vadd.f32 %v2525_v23, %v565_v24  ;;  %v560_v27 = vmul.f32 %v2961_v25, %v544_v10 }
 0x15a   : > { %573 = vst.msk [vmem:[#allocation2] sm:$0xff] %vm533_vm0, %v571_v26  ;;  %v566_v28 = vmul.f32 %v2524_v21, %v560_v27 }
 0x15c   : > { %v572_v29 = vadd.f32 %v2525_v23, %v566_v28 }
 0x15e   : > { %574 = vst.msk [vmem:[#allocation2 + $0x8] sm:$0xff] %vm533_vm0, %v572_v29 }
 0x15f PF: > { %v2962_v30 = vld [vmem:[%s3227_s28] sm:$0xff]   ;;  %v3119_v31 = vmov 0.0   ;;  %v2963_v32 = vld [vmem:[%s3227_s28 + $0x8] sm:$0xff]   ;;  %vm3120_vm1 = vmmov 0   ;;  %vm628_vm2 = vcmask 261120   ;;  %v2964_v37 = vld [vmem:[%s3227_s28 + $0x10] sm:$0xff]  }
 0x160   : > { %2714 = vmatprep.subr.bf16.mxu0 %v3119_v31  ;;  %2722 = vmatprep.subr.bf16.mxu1 %v3119_v31  ;;  %v2965_v38 = vld [vmem:[%s3227_s28 + $0x18] sm:$0xff]   ;;  %v2966_v39 = vld [vmem:[%s3227_s28 + $0x20] sm:$0xff]   ;;  %v2967_v40 = vld [vmem:[%s3227_s28 + $0x28] sm:$0xff]   ;;  %vm1287_vm3 = vcmask 130048   ;;  %vm1528_vm4 = vcmask 1043456   ;;  %s3634_s1 = sld [smem:[#allocation14_spill]] }
 0x161   : > { %2715 = vmatpush3.bf16.msra.mxu0 %v2962_v30  ;;  %2723 = vmatpush3.bf16.msra.mxu1 %v2962_v30  ;;  %v3272_v33 = vld [vmem:[#allocation2] sm:$0xff]  ;;  %v2968_v41 = vld [vmem:[%s3227_s28 + $0x30] sm:$0xff]   ;;  %v2969_v42 = vld [vmem:[%s3227_s28 + $0x38] sm:$0xff]   ;;  %vm1472_vm5 = vcmask 64512   ;;  %vm2075_vm6 = vcmask 523264   ;;  %p2612_p10 = scmp.ne.s32.totalorder %s3213_s0, 1 }
 0x162   : > { %2716 = vmatprep.subr.bf16.mxu0 %v3119_v31  ;;  %2724 = vmatprep.subr.bf16.mxu1 %v3119_v31  ;;  %v3284_v35 = vpack.c.bf16 %v3272_v33, %v3272_v33  ;;  %v2970_v43 = vld [vmem:[%s3227_s28 + $0x40] sm:$0xff]   ;;  %v2971_v44 = vld [vmem:[%s3227_s28 + $0x48] sm:$0xff]   ;;  %v2972_v45 = vld [vmem:[%s3227_s28 + $0x50] sm:$0xff]   ;;  %vm3122_vm7 = vmmov (!%p2612_p10), 0   ;;  %s2168_s12 = sld [smem:[#allocation4]] (!%p2612_p10)  ;;  %s2614_s19 = sld [smem:[#allocation4 + $0x1]] (!%p2612_p10) }
 0x163   : > { %2718 = vmatprep.mubr.msk.bf16.mxu0 %vm3120_vm1, %v3119_v31  ;;  %2726 = vmatprep.mubr.msk.bf16.mxu1 %vm3120_vm1, %v3119_v31  ;;  %v2973_v46 = vld [vmem:[%s3227_s28 + $0x58] sm:$0xff]   ;;  %v2550_v63 = vld [vmem:[%s3237_s18 + $0x4] ss:$0 sm:$0xff]  ;;  %v2551_v0 = vld [vmem:[%s3237_s18 + $0x5] ss:$0 sm:$0xff]  ;;  %s2613_s14 = sld [smem:[#allocation4 + $0x80]] (!%p2612_p10) }
 0x164   : > { %v2526_v13 = vld [vmem:[%s3237_s18] ss:$0 sm:$0xff]  ;;  %v2527_v14 = vld [vmem:[%s3237_s18 + $0x1] ss:$0 sm:$0xff]  ;;  %v2552_v17 = vld [vmem:[%s3237_s18 + $0x6] ss:$0 sm:$0xff] }
 0x165   : > { %v3274_v34 = vld [vmem:[#allocation2 + $0x8] sm:$0xff]  ;;  %2717 = vmatpush3.bf16.msra.mxu0 %v2963_v32  ;;  %2725 = vmatpush3.bf16.msra.mxu1 %v2963_v32  ;;  %v2553_v18 = vld [vmem:[%s3237_s18 + $0x7] ss:$0 sm:$0xff]  ;;  %s2615_s28 = sld [smem:[#allocation4 + $0x81]] (!%p2612_p10)  ;;  %s2617_s16 = sld [smem:[#allocation4 + $0x82]] (!%p2612_p10)  ;;  %vm2245_vm8 = vcmask (!%p2612_p10), 1040384  }
 0x166   : > { %v3288_v36 = vpack.c.bf16 %v3274_v34, %v3274_v34  ;;  %2730 = vmatprep.subr.bf16.mxu0 %v3119_v31  ;;  %2738 = vmatprep.subr.bf16.mxu1 %v3119_v31  ;;  %s2618_s17 = sld [smem:[#allocation4 + $0x3]] (!%p2612_p10)  ;;  %s2620_s26 = sld [smem:[#allocation4 + $0x4]] (!%p2612_p10)  ;;  %vm2247_vm9 = vcmask (!%p2612_p10), 1041408   ;;  %vm2249_vm10 = vcmask (!%p2612_p10), 1042432   ;;  %vm2252_vm11 = vcmask (!%p2612_p10), 1044480  }
 0x167   : > { %s2619_s23 = sld [smem:[#allocation4 + $0x83]] (!%p2612_p10)  ;;  %s3527_s20 = sld [smem:[#allocation4 + $0x84]] (!%p2612_p10)  ;;  %vm2254_vm12 = vcmask (!%p2612_p10), 1045504   ;;  %vm2256_vm13 = vcmask (!%p2612_p10), 1046528  }
 0x168   : > { %2719 = vmatmul.mubr.msk.bf16.vlgmr.msra.gmra.mrb[0].mxu0 %vm628_vm2, %v3284_v35  ;;  %2727 = vmatmul.mubr.msk.bf16.vlgmr.msra.gmra.mrb[0].mxu1 %vm628_vm2, %v3288_v36  ;;  %s3529_s21 = sld [smem:[#allocation4 + $0x5]] (!%p2612_p10) }
 0x169   : > { %2731 = vmatpush3.bf16.msra.mxu0 %v2964_v37  ;;  %2739 = vmatpush3.bf16.msra.mxu1 %v2964_v37 }
 0x16a   : > { %2732 = vmatprep.subr.bf16.mxu0 %v3119_v31  ;;  %2740 = vmatprep.subr.bf16.mxu1 %v3119_v31 }
 0x16b   : > { %2734 = vmatprep.mubr.msk.bf16.mxu0 %vm3120_vm1, %v3119_v31  ;;  %2742 = vmatprep.mubr.msk.bf16.mxu1 %vm3120_vm1, %v3119_v31  ;;  %s2179_s29 = scalar_lea.vmem (!%p2612_p10), [#allocation2], %s2615_s28  ;;  %s2186_s30 = scalar_lea.vmem (!%p2612_p10), [#allocation2], %s2617_s16 }
 0x16c   : > { %s2191_s6 = scalar_lea.vmem (!%p2612_p10), [#allocation2], %s2618_s17  ;;  %s2625_s16 = sld [smem:[#allocation4 + $0x86]] (!%p2612_p10) }
 0x16d   : > { %2733 = vmatpush3.bf16.msra.mxu0 %v2965_v38  ;;  %2741 = vmatpush3.bf16.msra.mxu1 %v2965_v38  ;;  %v2528_v38 = vld [vmem:[%s3237_s18 + $0x2] ss:$0 sm:$0xff]  ;;  %s2627_s17 = sld [smem:[#allocation4 + $0x87]] (!%p2612_p10) }
 0x16e   : > { %2746 = vmatprep.subr.bf16.mxu0 %v3119_v31  ;;  %2754 = vmatprep.subr.bf16.mxu1 %v3119_v31 }
 0x170   : > { %2735 = vmatmul.mubr.msk.bf16.vlgmr.msra.gmra.mrb[4].mxu0 %vm628_vm2, %v3284_v35  ;;  %2743 = vmatmul.mubr.msk.bf16.vlgmr.msra.gmra.mrb[4].mxu1 %vm628_vm2, %v3288_v36 }
 0x171   : > { %2747 = vmatpush3.bf16.msra.mxu0 %v2966_v39  ;;  %2755 = vmatpush3.bf16.msra.mxu1 %v2966_v39  ;;  %v2529_v39 = vld [vmem:[%s3237_s18 + $0x3] ss:$0 sm:$0xff] }
 0x172   : > { %2748 = vmatprep.subr.bf16.mxu0 %v3119_v31  ;;  %2756 = vmatprep.subr.bf16.mxu1 %v3119_v31 }
 0x173   : > { %2750 = vmatprep.mubr.msk.bf16.mxu0 %vm3120_vm1, %v3119_v31  ;;  %2758 = vmatprep.mubr.msk.bf16.mxu1 %vm3120_vm1, %v3119_v31 }
 0x175   : > { %2749 = vmatpush3.bf16.msra.mxu0 %v2967_v40  ;;  %2757 = vmatpush3.bf16.msra.mxu1 %v2967_v40 }
 0x176   : > { %2762 = vmatprep.subr.bf16.mxu0 %v3119_v31  ;;  %2770 = vmatprep.subr.bf16.mxu1 %v3119_v31 }
 0x178   : > { %2751 = vmatmul.mubr.msk.bf16.vlgmr.msra.gmra.mrb[8].mxu0 %vm628_vm2, %v3284_v35  ;;  %2759 = vmatmul.mubr.msk.bf16.vlgmr.msra.gmra.mrb[8].mxu1 %vm628_vm2, %v3288_v36 }
 0x179   : > { %2763 = vmatpush3.bf16.msra.mxu0 %v2968_v41  ;;  %2771 = vmatpush3.bf16.msra.mxu1 %v2968_v41 }
 0x17a   : > { %2764 = vmatprep.subr.bf16.mxu0 %v3119_v31  ;;  %2772 = vmatprep.subr.bf16.mxu1 %v3119_v31 }
 0x17b   : > { %2766 = vmatprep.mubr.msk.bf16.mxu0 %vm3120_vm1, %v3119_v31  ;;  %2774 = vmatprep.mubr.msk.bf16.mxu1 %vm3120_vm1, %v3119_v31 }
 0x17d   : > { %2765 = vmatpush3.bf16.msra.mxu0 %v2969_v42  ;;  %2773 = vmatpush3.bf16.msra.mxu1 %v2969_v42 }
 0x17e   : > { %2778 = vmatprep.subr.bf16.mxu0 %v3119_v31  ;;  %2786 = vmatprep.subr.bf16.mxu1 %v3119_v31 }
 0x180   : > { %2767 = vmatmul.mubr.msk.bf16.vlgmr.msra.gmra.mrb[12].mxu0 %vm628_vm2, %v3284_v35  ;;  %2775 = vmatmul.mubr.msk.bf16.vlgmr.msra.gmra.mrb[12].mxu1 %vm628_vm2, %v3288_v36 }
 0x181   : > { %2779 = vmatpush3.bf16.msra.mxu0 %v2970_v43  ;;  %2787 = vmatpush3.bf16.msra.mxu1 %v2970_v43 }
 0x182   : > { %2780 = vmatprep.subr.bf16.mxu0 %v3119_v31  ;;  %2788 = vmatprep.subr.bf16.mxu1 %v3119_v31 }
 0x183   : > { %2782 = vmatprep.mubr.msk.bf16.mxu0 %vm3120_vm1, %v3119_v31  ;;  %2790 = vmatprep.mubr.msk.bf16.mxu1 %vm3120_vm1, %v3119_v31 }
 0x185   : > { %2781 = vmatpush3.bf16.msra.mxu0 %v2971_v44  ;;  %2789 = vmatpush3.bf16.msra.mxu1 %v2971_v44 }
 0x186   : > { %2794 = vmatprep.subr.bf16.mxu0 %v3119_v31  ;;  %2802 = vmatprep.subr.bf16.mxu1 %v3119_v31 }
 0x188   : > { %2783 = vmatmul.mubr.msk.bf16.vlgmr.msra.gmra.mrb[16].mxu0 %vm628_vm2, %v3284_v35  ;;  %2791 = vmatmul.mubr.msk.bf16.vlgmr.msra.gmra.mrb[16].mxu1 %vm628_vm2, %v3288_v36 }
 0x189   : > { %2798 = vmatprep.mubr.msk.bf16.mxu0 %vm3120_vm1, %v3119_v31  ;;  %2806 = vmatprep.mubr.msk.bf16.mxu1 %vm3120_vm1, %v3119_v31 }
 0x18a   : > { %2795 = vmatpush3.bf16.msra.mxu0 %v2972_v45  ;;  %2803 = vmatpush3.bf16.msra.mxu1 %v2972_v45 }
 0x18b   : > { %2796 = vmatprep.subr.bf16.mxu0 %v3119_v31  ;;  %2804 = vmatprep.subr.bf16.mxu1 %v3119_v31 }
 0x18e   : > { %2797 = vmatpush3.bf16.msra.mxu0 %v2973_v46  ;;  %2805 = vmatpush3.bf16.msra.mxu1 %v2973_v46  ;;  %v2574_v46 = vld [vmem:[%s3237_s18 + $0x8] ss:$0 sm:$0xff] }
 0x18f   : > { %2810 = vmatprep.subr.bf16.mxu0 %v3119_v31  ;;  %2816 = vmatprep.subr.bf16.mxu1 %v3119_v31 }
 0x191   : > { %2799 = vmatmul.mubr.msk.bf16.vlgmr.msra.gmra.mrb[20].mxu0 %vm628_vm2, %v3284_v35  ;;  %2807 = vmatmul.mubr.msk.bf16.vlgmr.msra.gmra.mrb[20].mxu1 %vm628_vm2, %v3288_v36 }
 0x192   : > { %2812 = vmatprep.mubr.msk.bf16.mxu0 %vm3120_vm1, %v3119_v31  ;;  %2818 = vmatprep.mubr.msk.bf16.mxu1 %vm3120_vm1, %v3119_v31 }
 0x23b   : > { %v666_v47 = vpop.f32.mrb[0].mxu0  ;;  %v709_v48 = vpop.f32.mrb[0].mxu1 }
 0x23c   : > { %v2720_v49 = vpop.f32.mrb[1].mxu0  ;;  %v2728_v50 = vpop.f32.mrb[1].mxu1  ;;  %v667_v19 = vadd.f32 %v2526_v13, %v666_v47  ;;  %v710_v20 = vadd.f32 %v2527_v14, %v709_v48  ;;  %v2575_v47 = vld [vmem:[%s3237_s18 + $0x9] ss:$0 sm:$0xff]  ;;  %v2586_v14 = vld [vmem:[%s3634_s1] ss:$0 sm:$0xff] }
 0x23d   : > { %v669_v51 = vpop.f32.mrb[2].mxu0  ;;  %v712_v52 = vpop.f32.mrb[2].mxu1 }
 0x23e   : > { %v2721_v53 = vpop.f32.mrb[3].mxu0  ;;  %v2729_v54 = vpop.f32.mrb[3].mxu1  ;;  %v1251_v29 = vpack.c.bf16 %v667_v19, %v667_v19  ;;  %v1252_v30 = vpack.c.bf16 %v710_v20, %v710_v20 }
 0x243   : > { %v761_v55 = vpop.f32.mrb[4].mxu0  ;;  %v801_v56 = vpop.f32.mrb[4].mxu1 }
 0x244   : > { %v2736_v57 = vpop.f32.mrb[5].mxu0  ;;  %v2744_v58 = vpop.f32.mrb[5].mxu1  ;;  %v762_v42 = vadd.f32 %v2528_v38, %v761_v55  ;;  %v802_v43 = vadd.f32 %v2529_v39, %v801_v56 }
 0x245   : > { %v764_v59 = vpop.f32.mrb[6].mxu0  ;;  %v804_v60 = vpop.f32.mrb[6].mxu1 }
 0x246   : > { %v2737_v61 = vpop.f32.mrb[7].mxu0  ;;  %v2745_v62 = vpop.f32.mrb[7].mxu1  ;;  %v1253_v44 = vpack.c.bf16 %v762_v42, %v762_v42  ;;  %v1254_v45 = vpack.c.bf16 %v802_v43, %v802_v43 }
 0x247   : > { %v2576_v62 = vld [vmem:[%s3237_s18 + $0xa] ss:$0 sm:$0xff] }
 0x24b   : > { %v891_v1 = vpop.f32.mrb[8].mxu0  ;;  %v931_v2 = vpop.f32.mrb[8].mxu1 }
 0x24c   : > { %v892_v3 = vadd.f32 %v2550_v63, %v891_v1  ;;  %v932_v4 = vadd.f32 %v2551_v0, %v931_v2  ;;  %v2752_v5 = vpop.f32.mrb[9].mxu0  ;;  %v2760_v6 = vpop.f32.mrb[9].mxu1  ;;  %v2577_v63 = vld [vmem:[%s3237_s18 + $0xb] ss:$0 sm:$0xff]  ;;  %s2616_s18 = sld [smem:[#allocation4 + $0x2]] (!%p2612_p10) }
 0x24d   : > { %v894_v7 = vpop.f32.mrb[10].mxu0  ;;  %v934_v8 = vpop.f32.mrb[10].mxu1 }
 0x24e   : > { %v1255_v9 = vpack.c.bf16 %v892_v3, %v892_v3  ;;  %v1256_v10 = vpack.c.bf16 %v932_v4, %v932_v4  ;;  %v2753_v11 = vpop.f32.mrb[11].mxu0  ;;  %v2761_v12 = vpop.f32.mrb[11].mxu1 }
 0x250   : > { %v1292_v15 = vsel %vm1287_vm3, %v1255_v9, 0  ;;  %v1338_v16 = vsel %vm1287_vm3, %v1256_v10, 0 }
 0x251   : > { %2811 = vmatpush3.bf16.xpose.msra.mxu0 %v1292_v15  ;;  %2817 = vmatpush3.bf16.xpose.msra.mxu1 %v1338_v16  ;;  %v2587_v16 = vld [vmem:[%s3634_s1 + $0x1] ss:$0 sm:$0xff] }
 0x252   : > { %2822 = vmatprep.subr.bf16.mxu0 %v3119_v31  ;;  %2828 = vmatprep.subr.bf16.mxu1 %v3119_v31  ;;  %s2184_s22 = scalar_lea.vmem (!%p2612_p10), [#allocation2], %s2616_s18  ;;  %s2624_s18 = sld [smem:[#allocation4 + $0x6]] (!%p2612_p10) }
 0x253   : > { %v983_v21 = vpop.f32.mrb[12].mxu0  ;;  %v1023_v22 = vpop.f32.mrb[12].mxu1 }
 0x254   : > { %v984_v23 = vadd.f32 %v2552_v17, %v983_v21  ;;  %v1024_v24 = vadd.f32 %v2553_v18, %v1023_v22  ;;  %v2768_v25 = vpop.f32.mrb[13].mxu0  ;;  %v2776_v26 = vpop.f32.mrb[13].mxu1 }
 0x255   : > { %v986_v27 = vpop.f32.mrb[14].mxu0  ;;  %v1026_v28 = vpop.f32.mrb[14].mxu1 }
 0x256   : > { %v1257_v32 = vpack.c.bf16 %v984_v23, %v984_v23  ;;  %v1258_v35 = vpack.c.bf16 %v1024_v24, %v1024_v24  ;;  %v2769_v36 = vpop.f32.mrb[15].mxu0  ;;  %v2777_v37 = vpop.f32.mrb[15].mxu1  ;;  %v2588_v27 = vld [vmem:[%s3634_s1 + $0x2] ss:$0 sm:$0xff] }
 0x258   : > { %v1384_v40 = vsel %vm1287_vm3, %v1257_v32, 0  ;;  %v1430_v41 = vsel %vm1287_vm3, %v1258_v35, 0  ;;  %2813 = vmatmul.mubr.msk.bf16.vlgmr.msra.gmra.mrb[24].mxu0 %vm1287_vm3, %v1251_v29  ;;  %2819 = vmatmul.mubr.msk.bf16.vlgmr.msra.gmra.mrb[24].mxu1 %vm1287_vm3, %v1252_v30  ;;  %v2589_v29 = vld [vmem:[%s3634_s1 + $0x3] ss:$0 sm:$0xff]  ;;  %s2193_s1 = scalar_lea.vmem (!%p2612_p10), [#allocation2], %s2619_s23  ;;  %s2214_s23 = scalar_lea.vmem (!%p2612_p10), [#allocation2], %s2625_s16 }
 0x259   : > { %2823 = vmatpush3.bf16.xpose.msra.mxu0 %v1384_v40  ;;  %2829 = vmatpush3.bf16.xpose.msra.mxu1 %v1430_v41 }
 0x25a   : > { %2824 = vmatprep.mubr.msk.bf16.mxu0 %vm3120_vm1, %v3119_v31  ;;  %2830 = vmatprep.mubr.msk.bf16.mxu1 %vm3120_vm1, %v3119_v31 }
 0x25b   : > { %2834 = vmatprep.subr.bf16.mxu0 %v3119_v31  ;;  %2840 = vmatprep.subr.bf16.mxu1 %v3119_v31  ;;  %v1113_v48 = vpop.f32.mrb[16].mxu0  ;;  %v1153_v49 = vpop.f32.mrb[16].mxu1 }
 0x25c   : > { %v1114_v50 = vadd.f32 %v2574_v46, %v1113_v48  ;;  %v2784_v51 = vpop.f32.mrb[17].mxu0  ;;  %v1154_v52 = vadd.f32 %v2575_v47, %v1153_v49  ;;  %v2792_v53 = vpop.f32.mrb[17].mxu1 }
 0x25d   : > { %v1116_v54 = vpop.f32.mrb[18].mxu0  ;;  %v1156_v55 = vpop.f32.mrb[18].mxu1 }
 0x25e   : > { %v1521_v56 = vpack.c.bf16 %v1114_v50, %v1114_v50  ;;  %v2785_v57 = vpop.f32.mrb[19].mxu0  ;;  %v1522_v58 = vpack.c.bf16 %v1154_v52, %v1154_v52  ;;  %v2793_v59 = vpop.f32.mrb[19].mxu1 }
 0x260   : > { %2825 = vmatmul.mubr.msk.bf16.vlgmr.msra.gmra.mrb[28].mxu0 %vm1287_vm3, %v1253_v44  ;;  %2831 = vmatmul.mubr.msk.bf16.vlgmr.msra.gmra.mrb[28].mxu1 %vm1287_vm3, %v1254_v45  ;;  %v1530_v60 = vsel %vm1528_vm4, %v1521_v56, 0  ;;  %v1576_v61 = vsel %vm1528_vm4, %v1522_v58, 0 }
 0x261   : > { %2836 = vmatprep.mubr.msk.bf16.mxu0 %vm3120_vm1, %v3119_v31  ;;  %2842 = vmatprep.mubr.msk.bf16.mxu1 %vm3120_vm1, %v3119_v31 }
 0x262   : > { %2835 = vmatpush3.bf16.msra.mxu0 %v1530_v60  ;;  %2841 = vmatpush3.bf16.msra.mxu1 %v1576_v61 }
 0x263   : > { %2846 = vmatprep.subr.bf16.mxu0 %v3119_v31  ;;  %2852 = vmatprep.subr.bf16.mxu1 %v3119_v31 }
 0x264   : > { %v1205_v0 = vpop.f32.mrb[20].mxu0  ;;  %v1245_v1 = vpop.f32.mrb[20].mxu1 }
 0x265   : > { %v1206_v2 = vadd.f32 %v2576_v62, %v1205_v0  ;;  %v2800_v3 = vpop.f32.mrb[21].mxu0  ;;  %v1246_v4 = vadd.f32 %v2577_v63, %v1245_v1  ;;  %v2808_v5 = vpop.f32.mrb[21].mxu1 }
 0x266   : > { %v1208_v6 = vpop.f32.mrb[22].mxu0  ;;  %v1248_v7 = vpop.f32.mrb[22].mxu1 }
 0x267   : > { %v1523_v8 = vpack.c.bf16 %v1206_v2, %v1206_v2  ;;  %v2801_v9 = vpop.f32.mrb[23].mxu0  ;;  %v1524_v10 = vpack.c.bf16 %v1246_v4, %v1246_v4  ;;  %v2809_v11 = vpop.f32.mrb[23].mxu1 }
 0x269   : > { %v3407_v12 = vsel %vm1528_vm4, %v1523_v8, 0  ;;  %v3410_v13 = vsel %vm1528_vm4, %v1524_v10, 0 }
 0x32b   : > { %v1328_v15 = vpop.f32.mrb[24].mxu0  ;;  %v1374_v17 = vpop.f32.mrb[24].mxu1 }
 0x32c   : > { %v1329_v18 = vadd.f32 %v2586_v14, %v1328_v15  ;;  %v2814_v19 = vpop.f32.mrb[25].mxu0  ;;  %v2820_v20 = vpop.f32.mrb[25].mxu1  ;;  %v1375_v23 = vadd.f32 %v2587_v16, %v1374_v17 }
 0x32d   : > { %v1331_v21 = vpop.f32.mrb[26].mxu0  ;;  %v1377_v22 = vpop.f32.mrb[26].mxu1  ;;  %v2975_v19 = vld [vmem:[%s3222_s25 + $0x8] sm:$0xff]  }
 0x32e   : > { %v2815_v24 = vpop.f32.mrb[27].mxu0  ;;  %v2821_v25 = vpop.f32.mrb[27].mxu1  ;;  %v1473_v26 = vsel %vm1472_vm5, %v1329_v18, -inf  ;;  %v1476_v28 = vsel %vm1472_vm5, %v1375_v23, -inf }
 0x32f   : > { %1474 = vmax.xlane.f32.xlu0 %v1473_v26 }
 0x333   : > { %v1466_v30 = vpop.f32.mrb[28].mxu1  ;;  %1477 = vmax.xlane.f32.xlu0 %v1476_v28  ;;  %v1420_v32 = vpop.f32.mrb[28].mxu0 }
 0x334   : > { %v1421_v35 = vadd.f32 %v2588_v27, %v1420_v32  ;;  %v2826_v36 = vpop.f32.mrb[29].mxu0  ;;  %v2832_v37 = vpop.f32.mrb[29].mxu1  ;;  %v1467_v40 = vadd.f32 %v2589_v29, %v1466_v30 }
 0x335   : > { %v1423_v38 = vpop.f32.mrb[30].mxu0  ;;  %v1469_v39 = vpop.f32.mrb[30].mxu1 }
 0x336   : > { %v2827_v41 = vpop.f32.mrb[31].mxu0  ;;  %v2833_v42 = vpop.f32.mrb[31].mxu1  ;;  %v1479_v43 = vsel %vm1472_vm5, %v1421_v35, -inf  ;;  %v1482_v44 = vsel %vm1472_vm5, %v1467_v40, -inf }
 0x337   : > { %1480 = vmax.xlane.f32.xlu1 %v1479_v43  ;;  %v1908_v42 = vlaneseq }
 0x33b   : > { %1483 = vmax.xlane.f32.xlu1 %v1482_v44  ;;  %v3466_v44 = vshrl.u32 %v1908_v42, 7 }
 0x3bc   : > { %v1475_v45 = vpop.xlane.xlu0 %1474 }
 0x3bd   : > { %v1485_v46 = vsub.f32 %v1329_v18, %v1475_v45 }
 0x3bf   : > { %v1489_v47 = vmul.f32 1.442695, %v1485_v46 }
 0x3c0   : > { %v1478_v48 = vpop.xlane.xlu0 %1477 }
 0x3c1   : > { %2982 = vpow2.f32 %v1489_v47  ;;  %v1486_v49 = vsub.f32 %v1375_v23, %v1478_v48 }
 0x3c3   : > { %v1491_v50 = vmul.f32 1.442695, %v1486_v49  ;;  %v1910_v49 = vsub.s32 0, %v3466_v44 }
 0x3c4   : > { %v1481_v51 = vpop.xlane.xlu1 %1480 }
 0x3c5   : > { %2984 = vpow2.f32 %v1491_v50  ;;  %v1487_v52 = vsub.f32 %v1421_v35, %v1481_v51  ;;  %v3470_v51 = vld [vmem:[%s3247_s27] sm:$0x7f]  ;;  %s2177_s27 = scalar_lea.vmem (!%p2612_p10), [#allocation2], %s2614_s19  ;;  %s2205_s19 = scalar_lea.vmem (!%p2612_p10), [#allocation2], %s3529_s21 }
 0x3c7   : > { %v1493_v53 = vmul.f32 1.442695, %v1487_v52 }
 0x3c8   : > { %v1484_v54 = vpop.xlane.xlu1 %1483 }
 0x3c9   : > { %2986 = vpow2.f32 %v1493_v53  ;;  %v1488_v55 = vsub.f32 %v1467_v40, %v1484_v54 }
 0x3cb   : > { %v2983_v56 = vpop.eup %2982  ;;  %v1495_v57 = vmul.f32 1.442695, %v1488_v55  ;;  %v1911_v55 = vrot.slane %v3470_v51, %v1910_v49 }
 0x3cc   : > { %v1497_v58 = vsel %vm1472_vm5, %v2983_v56, 0.0 }
 0x3cd   : > { %2988 = vpow2.f32 %v1495_v57  ;;  %1498 = vadd.xlane.f32.xlu0 %v1497_v58 }
 0x3cf   : > { %v2985_v59 = vpop.eup %2984 }
 0x3d0   : > { %v1500_v60 = vsel %vm1472_vm5, %v2985_v59, 0.0 }
 0x3d1   : > { %1501 = vadd.xlane.f32.xlu1 %v1500_v60 }
 0x3d3   : > { %v2987_v61 = vpop.eup %2986 }
 0x3d4   : > { %v1503_v62 = vsel %vm1472_vm5, %v2987_v61, 0.0 }
 0x3d5   : > { %1504 = vadd.xlane.f32.xlu0 %v1503_v62 }
 0x3d7   : > { %v2989_v63 = vpop.eup %2988 }
 0x3d8   : > { %v1506_v0 = vsel %vm1472_vm5, %v2989_v63, 0.0 }
 0x3d9   : > { %1507 = vadd.xlane.f32.xlu1 %v1506_v0 }
 0x45a   : > { %v1499_v1 = vpop.xlane.xlu0 %1498 }
 0x45b   : > { %2990 = vrcp.f32 %v1499_v1 }
 0x45e   : > { %v1502_v2 = vpop.xlane.xlu1 %1501 }
 0x45f   : > { %2992 = vrcp.f32 %v1502_v2 }
 0x462   : > { %v1505_v3 = vpop.xlane.xlu0 %1504 }
 0x463   : > { %2994 = vrcp.f32 %v1505_v3 }
 0x465   : > { %v2991_v4 = vpop.eup %2990 }
 0x466   : > { %v1510_v5 = vmul.f32 %v2991_v4, %v2983_v56  ;;  %v1508_v6 = vpop.xlane.xlu1 %1507 }
 0x467   : > { %2996 = vrcp.f32 %v1508_v6 }
 0x468   : > { %v1517_v7 = vpack.c.bf16 %v1510_v5, %v1510_v5 }
 0x469   : > { %v2993_v8 = vpop.eup %2992 }
 0x46a   : > { %v1512_v9 = vmul.f32 %v2993_v8, %v2985_v59  ;;  %2837 = vmatmul.mubr.msk.bf16.vlgmr.msra.gmra.mrb[32].mxu0 %vm1472_vm5, %v1517_v7 }
 0x46b   : > { %2847 = vmatpush3.bf16.msra.mxu0 %v3407_v12  ;;  %2848 = vmatprep.mubr.msk.bf16.mxu0 %vm3120_vm1, %v3119_v31 }
 0x46c   : > { %v1518_v10 = vpack.c.bf16 %v1512_v9, %v1512_v9  ;;  %2858 = vmatprep.subr.bf16.mxu0 %v3119_v31 }
 0x46d   : > { %v2995_v11 = vpop.eup %2994 }
 0x46e   : > { %v1514_v14 = vmul.f32 %v2995_v11, %v2987_v61  ;;  %2843 = vmatmul.mubr.msk.bf16.vlgmr.msra.gmra.mrb[32].mxu1 %vm1472_vm5, %v1518_v10 }
 0x46f   : > { %2853 = vmatpush3.bf16.msra.mxu1 %v3410_v13  ;;  %2854 = vmatprep.mubr.msk.bf16.mxu1 %vm3120_vm1, %v3119_v31  ;;  %v2974_v13 = vld [vmem:[%s3222_s25] sm:$0xff]   ;;  %s3531_s25 = sld [smem:[#allocation4 + $0x85]] (!%p2612_p10) }
 0x470   : > { %v1519_v15 = vpack.c.bf16 %v1514_v14, %v1514_v14  ;;  %2864 = vmatprep.subr.bf16.mxu1 %v3119_v31 }
 0x471   : > { %v2997_v12 = vpop.eup %2996 }
 0x472   : > { %v1516_v16 = vmul.f32 %v2997_v12, %v2989_v63  ;;  %2849 = vmatmul.mubr.msk.bf16.vlgmr.msra.gmra.mrb[36].mxu0 %vm1472_vm5, %v1519_v15 }
 0x473   : > { %2860 = vmatprep.mubr.msk.bf16.mxu0 %vm3120_vm1, %v3119_v31  ;;  %2859 = vmatpush3.bf16.msra.mxu0 %v2974_v13 }
 0x474   : > { %v1520_v17 = vpack.c.bf16 %v1516_v16, %v1516_v16  ;;  %2870 = vmatprep.subr.bf16.mxu0 %v3119_v31 }
 0x475   : > { %s2207_s28 = scalar_lea.vmem (!%p2612_p10), [#allocation2], %s3531_s25 }
 0x476   : > { %2855 = vmatmul.mubr.msk.bf16.vlgmr.msra.gmra.mrb[36].mxu1 %vm1472_vm5, %v1520_v17 }
 0x477   : > { %2866 = vmatprep.mubr.msk.bf16.mxu1 %vm3120_vm1, %v3119_v31  ;;  %2865 = vmatpush3.bf16.msra.mxu1 %v2974_v13 }
 0x478   : > { %2876 = vmatprep.subr.bf16.mxu1 %v3119_v31 }
 0x53d   : > { %v1566_v18 = vpop.f32.mrb[32].mxu0 }
 0x53e   : > { %v1714_v20 = vpack.c.bf16 %v1566_v18, %v1566_v18  ;;  %v2838_v21 = vpop.f32.mrb[33].mxu0 }
 0x53f   : > { %v1569_v22 = vpop.f32.mrb[34].mxu0 }
 0x540   : > { %v2839_v23 = vpop.f32.mrb[35].mxu0  ;;  %2861 = vmatmul.mubr.msk.bf16.vlgmr.msra.gmra.mrb[40].mxu0 %vm1287_vm3, %v1714_v20  ;;  %v2976_v20 = vld [vmem:[%s3232_s15] sm:$0xff]  }
 0x541   : > { %v1612_v24 = vpop.f32.mrb[32].mxu1  ;;  %2871 = vmatpush3.bf16.msra.mxu0 %v2975_v19  ;;  %2872 = vmatprep.mubr.msk.bf16.mxu0 %vm3120_vm1, %v3119_v31 }
 0x542   : > { %v1715_v25 = vpack.c.bf16 %v1612_v24, %v1612_v24  ;;  %v2844_v26 = vpop.f32.mrb[33].mxu1  ;;  %2882 = vmatprep.subr.bf16.mxu0 %v3119_v31 }
 0x543   : > { %v1615_v27 = vpop.f32.mrb[34].mxu1 }
 0x544   : > { %v2845_v28 = vpop.f32.mrb[35].mxu1  ;;  %2867 = vmatmul.mubr.msk.bf16.vlgmr.msra.gmra.mrb[40].mxu1 %vm1287_vm3, %v1715_v25  ;;  %v1945_v27 = vsub.s32 1, %v3466_v44 }
 0x545   : > { %v1658_v29 = vpop.f32.mrb[36].mxu0  ;;  %2877 = vmatpush3.bf16.msra.mxu1 %v2975_v19  ;;  %2878 = vmatprep.mubr.msk.bf16.mxu1 %vm3120_vm1, %v3119_v31 }
 0x546   : > { %v1716_v30 = vpack.c.bf16 %v1658_v29, %v1658_v29  ;;  %v2850_v32 = vpop.f32.mrb[37].mxu0  ;;  %2890 = vmatprep.subr.bf16.mxu1 %v3119_v31  ;;  %v1946_v29 = vrot.slane %v3470_v51, %v1945_v27 }
 0x547   : > { %v1661_v35 = vpop.f32.mrb[38].mxu0  ;;  %v1951_v32 = vsub.s32 2, %v3466_v44 }
 0x548   : > { %v2851_v36 = vpop.f32.mrb[39].mxu0  ;;  %2873 = vmatmul.mubr.msk.bf16.vlgmr.msra.gmra.mrb[44].mxu0 %vm1287_vm3, %v1716_v30 }
 0x549   : > { %v1704_v37 = vpop.f32.mrb[36].mxu1  ;;  %2886 = vmatprep.mubr.msk.bf16.mxu0 %vm3120_vm1, %v3119_v31  ;;  %2883 = vmatpush3.bf16.msra.mxu0 %v2976_v20 }
 0x54a   : > { %v1717_v38 = vpack.c.bf16 %v1704_v37, %v1704_v37  ;;  %v2856_v39 = vpop.f32.mrb[37].mxu1  ;;  %2884 = vmatprep.subr.bf16.mxu0 %v3119_v31 }
 0x54b   : > { %v1707_v40 = vpop.f32.mrb[38].mxu1 }
 0x54c   : > { %v2857_v41 = vpop.f32.mrb[39].mxu1  ;;  %2879 = vmatmul.mubr.msk.bf16.vlgmr.msra.gmra.mrb[44].mxu1 %vm1287_vm3, %v1717_v38  ;;  %v1952_v38 = vrot.slane %v3470_v51, %v1951_v32 }
 0x54d   : > { %2898 = vmatprep.mubr.msk.bf16.mxu1 %vm3120_vm1, %v3119_v31 }
 0x613   : > { %v1761_v43 = vpop.f32.mrb[40].mxu0 }
 0x614   : > { %v2862_v45 = vpop.f32.mrb[41].mxu0  ;;  %v1902_v56 = vsel %vm628_vm2, %v1761_v43, 0.0  ;;  %v2978_v43 = vld [vmem:[%s3242_s24] sm:$0xff]  }
 0x615   : > { %v1764_v46 = vpop.f32.mrb[42].mxu0  ;;  %2891 = vmatpush3.bf16.msra.mxu1 %v2978_v43  ;;  %v2979_v45 = vld [vmem:[%s3242_s24 + $0x8] sm:$0xff]  }
 0x616   : > { %v2863_v47 = vpop.f32.mrb[43].mxu0  ;;  %2892 = vmatprep.subr.bf16.mxu1 %v3119_v31  ;;  %v2980_v46 = vld [vmem:[%s3242_s24 + $0x10] sm:$0xff]  }
 0x617   : > { %v1804_v48 = vpop.f32.mrb[40].mxu1  ;;  %v2981_v47 = vld [vmem:[%s3242_s24 + $0x18] sm:$0xff]   ;;  %s2172_s24 = scalar_lea.vmem (!%p2612_p10), [#allocation2], %s2613_s14  ;;  %s2200_s14 = scalar_lea.vmem (!%p2612_p10), [#allocation2], %s3527_s20 }
 0x618   : > { %v2868_v50 = vpop.f32.mrb[41].mxu1  ;;  %v1905_v0 = vsel %vm628_vm2, %v1804_v48, 0.0  ;;  %v1962_v48 = vsub.s32 3, %v3466_v44  ;;  %s2221_s20 = scalar_lea.vmem (!%p2612_p10), [#allocation2], %s2627_s17 }
 0x619   : > { %v1807_v52 = vpop.f32.mrb[42].mxu1  ;;  %2893 = vmatpush3.bf16.msra.mxu1 %v2979_v45 }
 0x61a   : > { %v2869_v53 = vpop.f32.mrb[43].mxu1  ;;  %2894 = vmatprep.subr.bf16.mxu1 %v3119_v31  ;;  %v1963_v49 = vrot.slane %v3470_v51, %v1962_v48 }
 0x61b   : > { %v1853_v54 = vpop.f32.mrb[44].mxu0 }
 0x61c   : > { %v1903_v57 = vsel %vm628_vm2, %v1853_v54, 0.0  ;;  %v2874_v58 = vpop.f32.mrb[45].mxu0 }
 0x61d   : > { %v1904_v59 = vadd.f32 %v1903_v57, %v1902_v56  ;;  %v1856_v60 = vpop.f32.mrb[46].mxu0  ;;  %2895 = vmatpush3.bf16.msra.mxu1 %v2980_v46 }
 0x61e   : > { %v2875_v61 = vpop.f32.mrb[47].mxu0  ;;  %2896 = vmatprep.subr.bf16.mxu1 %v3119_v31 }
 0x61f   : > { %v1912_v62 = vadd.f32 %v1911_v55, %v1904_v59  ;;  %v1896_v63 = vpop.f32.mrb[44].mxu1 }
 0x620   : > { %v1906_v1 = vsel %vm628_vm2, %v1896_v63, 0.0  ;;  %v2880_v2 = vpop.f32.mrb[45].mxu1 }
 0x621   : > { %v1907_v3 = vadd.f32 %v1906_v1, %v1905_v0  ;;  %v1899_v4 = vpop.f32.mrb[46].mxu1  ;;  %v1914_v5 = vadd.f32 %v1912_v62, %v3272_v33  ;;  %2897 = vmatpush3.bf16.msra.mxu1 %v2981_v47 }
 0x622   : > { %v2881_v6 = vpop.f32.mrb[47].mxu1 }
 0x623   : > { %v1913_v7 = vadd.f32 %v1911_v55, %v1907_v3  ;;  %v1916_v8 = vsel %vm628_vm2, %v1914_v5, 0.0 }
 0x624   : > { %1917 = vadd.xlane.f32.xlu0 %v1916_v8 }
 0x625   : > { %v1915_v9 = vadd.f32 %v1913_v7, %v3274_v34  ;;  %v2977_v34 = vld [vmem:[%s3232_s15 + $0x8] sm:$0xff]   ;;  %s2170_s15 = scalar_lea.vmem (!%p2612_p10), [#allocation2], %s2168_s12  ;;  %s2198_s12 = scalar_lea.vmem (!%p2612_p10), [#allocation2], %s2620_s26 }
 0x626   : > { %2885 = vmatpush3.bf16.msra.mxu0 %v2977_v34 }
 0x627   : > { %v1919_v10 = vsel %vm628_vm2, %v1915_v9, 0.0 }
 0x628   : > { %1920 = vadd.xlane.f32.xlu1 %v1919_v10 }
 0x6b1   : > { %v1918_v11 = vpop.xlane.xlu0 %1917 }
 0x6b2   : > { %v1923_v14 = vmul.f32 0.03125, %v1918_v11  ;;  %v2049_v11 = vsub.s32 4, %v3466_v44 }
 0x6b4   : > { %v1925_v15 = vsub.f32 %v1914_v5, %v1923_v14  ;;  %v2050_v14 = vrot.slane %v3470_v51, %v2049_v11 }
 0x6b5   : > { %v1921_v12 = vpop.xlane.xlu1 %1920 }
 0x6b6   : > { %v1924_v16 = vmul.f32 0.03125, %v1921_v12  ;;  %v1927_v17 = vmul.f32 %v1925_v15, %v1925_v15 }
 0x6b8   : > { %v1926_v13 = vsub.f32 %v1915_v9, %v1924_v16  ;;  %v1929_v33 = vsel %vm628_vm2, %v1927_v17, 0.0 }
 0x6b9   : > { %1930 = vadd.xlane.f32.xlu0 %v1929_v33 }
 0x6ba   : > { %v1928_v18 = vmul.f32 %v1926_v13, %v1926_v13 }
 0x6bc   : > { %v1932_v19 = vsel %vm628_vm2, %v1928_v18, 0.0 }
 0x6bd   : > { %1933 = vadd.xlane.f32.xlu1 %v1932_v19 }
 0x746   : > { %v1931_v21 = vpop.xlane.xlu0 %1930 }
 0x747   : > { %v1935_v22 = vmul.f32 0.03125, %v1931_v21 }
 0x749   : > { %v1937_v23 = vadd.f32 1e-12, %v1935_v22 }
 0x74a   : > { %v1934_v24 = vpop.xlane.xlu1 %1933 }
 0x74b   : > { %2998 = vrsqrt.f32 %v1937_v23  ;;  %v1936_v25 = vmul.f32 0.03125, %v1934_v24 }
 0x74d   : > { %v1938_v26 = vadd.f32 1e-12, %v1936_v25 }
 0x74f   : > { %3000 = vrsqrt.f32 %v1938_v26 }
 0x755   : > { %v2999_v28 = vpop.eup %2998 }
 0x756   : > { %v1941_v30 = vmul.f32 %v2999_v28, %v1925_v15 }
 0x758   : > { %v1947_v36 = vmul.f32 %v1946_v29, %v1941_v30 }
 0x759   : > { %v3001_v35 = vpop.eup %3000 }
 0x75a   : > { %v1942_v37 = vmul.f32 %v3001_v35, %v1926_v13  ;;  %v1953_v40 = vadd.f32 %v1952_v38, %v1947_v36 }
 0x75c   : > { %v1948_v39 = vmul.f32 %v1946_v29, %v1942_v37 }
 0x75e   : > { %v1954_v41 = vadd.f32 %v1952_v38, %v1948_v39 }
 0x760   : > { %v1959_v42 = vpack.c.bf16 %v1954_v41, %v1953_v40 }
 0x762   : > { %2887 = vmatmul.mubr.msk.bf16.vlgmr.msra.gmra.mrb[48].mxu0 %vm628_vm2, %v1959_v42 }
 0x835   : > { %v2013_v50 = vpop.f32.mrb[48].mxu0 }
 0x836   : > { %v2014_v52 = vadd.f32 %v2013_v50, %v1963_v49  ;;  %v2888_v53 = vpop.f32.mrb[49].mxu0 }
 0x837   : > { %v2016_v54 = vpop.f32.mrb[50].mxu0 }
 0x838   : > { %v2022_v55 = vmul.f32 0.044715, %v2014_v52  ;;  %v2017_v56 = vadd.f32 %v2016_v54, %v1963_v49  ;;  %v2889_v57 = vpop.f32.mrb[51].mxu0  ;;  %v2020_v5 = vmul.f32 0.5, %v2014_v52  ;;  %v2261_v54 = vld [vmem:[%s3620_s10 + $0x10] sm:$0xff] (!%p2612_p10) }
 0x839   : > { %v2262_v57 = vld [vmem:[%s3620_s10 + $0x18] sm:$0xff] (!%p2612_p10) }
 0x83a   : > { %v2024_v58 = vmul.f32 %v2022_v55, %v2014_v52  ;;  %v2023_v59 = vmul.f32 0.044715, %v2017_v56  ;;  %v2021_v6 = vmul.f32 0.5, %v2017_v56  ;;  %v3121_v55 = vmov (!%p2612_p10), 0.0|0.0  }
 0x83b   : > { %2913 = vmatprep.subr.bf16.mxu0 (!%p2612_p10), %v3121_v55 }
 0x83c   : > { %v2026_v60 = vmul.f32 %v2024_v58, %v2014_v52  ;;  %v2025_v61 = vmul.f32 %v2023_v59, %v2017_v56  ;;  %v3123_v58 = vmov (!%p2612_p10), 0.0   ;;  %v2917_v59 = vpack.c.bf16 (!%p2612_p10), %v2262_v57, %v2261_v54 }
 0x83d   : > { %2910 = vmatprep.mubr.msk.f32.mxu0 (!%p2612_p10), %vm3122_vm7, %v3123_v58 }
 0x83e   : > { %v2028_v62 = vadd.f32 %v2026_v60, %v2014_v52  ;;  %v2027_v63 = vmul.f32 %v2025_v61, %v2017_v56 }
 0x840   : > { %v2030_v0 = vmul.f32 0.7978846, %v2028_v62  ;;  %v2029_v31 = vadd.f32 %v2027_v63, %v2017_v56 }
 0x842   : > { %3002 = vtanh.f32 %v2030_v0  ;;  %v2031_v1 = vmul.f32 0.7978846, %v2029_v31 }
 0x844   : > { %3004 = vtanh.f32 %v2031_v1 }
 0x84c   : > { %v3003_v2 = vpop.eup %3002 }
 0x84d   : > { %v2034_v3 = vadd.f32 1.0, %v3003_v2 }
 0x84e   : > { %v3005_v4 = vpop.eup %3004 }
 0x84f   : > { %v2035_v7 = vadd.f32 1.0, %v3005_v4  ;;  %v2036_v8 = vmul.f32 %v2034_v3, %v2020_v5 }
 0x851   : > { %v2037_v9 = vmul.f32 %v2035_v7, %v2021_v6 }
 0x853   : > { %v2046_v10 = vpack.c.bf16 %v2037_v9, %v2036_v8 }
 0x855   : > { %2899 = vmatmul.mubr.msk.bf16.vlgmr.msra.gmra.mrb[48].mxu1 %vm2075_vm6, %v2046_v10 }
 0x928   : > { %v2113_v15 = vpop.f32.mrb[48].mxu1 }
 0x929   : > { %v2114_v12 = vadd.f32 %v2113_v15, %v2050_v14  ;;  %v2900_v16 = vpop.f32.mrb[49].mxu1 }
 0x92a   : > { %v2116_v17 = vpop.f32.mrb[50].mxu1 }
 0x92b   : > { %v2117_v13 = vadd.f32 %v2116_v17, %v2050_v14  ;;  %v2901_v33 = vpop.f32.mrb[51].mxu1  ;;  %v2120_v18 = vadd.f32 %v2114_v12, %v1953_v40  ;;  %v2150_v40 = vsub.s32 5, %v3466_v44 }
 0x92d   : > { %v2122_v19 = vsel %vm628_vm2, %v2120_v18, 0.0  ;;  %v2121_v20 = vadd.f32 %v2117_v13, %v1954_v41  ;;  %v2156_v41 = vsub.s32 6, %v3466_v44  ;;  %v2151_v42 = vrot.slane %v3470_v51, %v2150_v40  ;;  %v2259_v44 = vld [vmem:[%s3620_s10] sm:$0xff] (!%p2612_p10) }
 0x92e   : > { %2123 = vadd.xlane.f32.xlu0 %v2122_v19 }
 0x92f   : > { %v2125_v34 = vsel %vm628_vm2, %v2121_v20, 0.0  ;;  %v2157_v45 = vrot.slane %v3470_v51, %v2156_v41  ;;  %v2260_v51 = vld [vmem:[%s3620_s10 + $0x8] sm:$0xff] (!%p2612_p10) }
 0x930   : > { %2126 = vadd.xlane.f32.xlu1 %v2125_v34  ;;  %v2914_v56 = vpack.c.bf16 (!%p2612_p10), %v2260_v51, %v2259_v44 }
 0x932   : > { %2915 = vmatpush3.bf16.msra.mxu0 (!%p2612_p10), %v2914_v56 }
 0x933   : > { %2916 = vmatprep.subr.bf16.mxu0 (!%p2612_p10), %v3121_v55 }
 0x936   : > { %2918 = vmatpush3.bf16.msra.mxu0 (!%p2612_p10), %v2917_v59 }
 0x9bb   : > { %v2124_v21 = vpop.xlane.xlu0 %2123 }
 0x9bc   : > { %v2128_v22 = vmul.f32 0.03125, %v2124_v21 }
 0x9bd   : > { %v2127_v23 = vpop.xlane.xlu1 %2126 }
 0x9be   : > { %v2130_v24 = vsub.f32 %v2120_v18, %v2128_v22  ;;  %v2129_v25 = vmul.f32 0.03125, %v2127_v23 }
 0x9c0   : > { %v2131_v26 = vsub.f32 %v2121_v20, %v2129_v25  ;;  %v2132_v27 = vmul.f32 %v2130_v24, %v2130_v24 }
 0x9c2   : > { %v2134_v28 = vsel %vm628_vm2, %v2132_v27, 0.0  ;;  %v2133_v29 = vmul.f32 %v2131_v26, %v2131_v26 }
 0x9c3   : > { %2135 = vadd.xlane.f32.xlu0 %v2134_v28 }
 0x9c4   : > { %v2137_v30 = vsel %vm628_vm2, %v2133_v29, 0.0 }
 0x9c5   : > { %2138 = vadd.xlane.f32.xlu1 %v2137_v30 }
 0xa50   : > { %v2136_v32 = vpop.xlane.xlu0 %2135 }
 0xa51   : > { %v2140_v35 = vmul.f32 0.03125, %v2136_v32  ;;  %v2628_v32 = vld [vmem:[%s3621_s11] ss:$0 sm:$0xff] (!%p2612_p10) }
 0xa52   : > { %v2139_v36 = vpop.xlane.xlu1 %2138 }
 0xa53   : > { %v2142_v37 = vadd.f32 1e-12, %v2140_v35  ;;  %v2141_v38 = vmul.f32 0.03125, %v2139_v36 }
 0xa55   : > { %3006 = vrsqrt.f32 %v2142_v37  ;;  %v2143_v39 = vadd.f32 1e-12, %v2141_v38 }
 0xa57   : > { %3008 = vrsqrt.f32 %v2143_v39 }
 0xa5f   : > { %v3007_v43 = vpop.eup %3006 }
 0xa60   : > { %v2146_v46 = vmul.f32 %v3007_v43, %v2130_v24 }
 0xa61   : > { %v3009_v47 = vpop.eup %3008 }
 0xa62   : > { %v2152_v48 = vmul.f32 %v2151_v42, %v2146_v46  ;;  %v2147_v49 = vmul.f32 %v3009_v47, %v2131_v26  ;;  %2165 = sbr.rel (%p2612_p10) target bundleno = 2907 (0xb5b), region = 72 }
 0xa64   : > { %v2158_v50 = vadd.f32 %v2157_v45, %v2152_v48  ;;  %v2153_v52 = vmul.f32 %v2151_v42, %v2147_v49 }
 0xa66   : > { %2160 = vst.msk [vmem:[#allocation2] sm:$0xff] %vm628_vm2, %v2158_v50  ;;  %v2159_v53 = vadd.f32 %v2157_v45, %v2153_v52  ;;  %2166 = vst.msk [vmem:[#allocation5] sm:$0xff] (!%p2612_p10), %vm628_vm2, %v2158_v50 }
 0xa68   : > { %2161 = vst.msk [vmem:[#allocation2 + $0x8] sm:$0xff] %vm628_vm2, %v2159_v53  ;;  %2167 = vst.msk [vmem:[#allocation5 + $0x8] sm:$0xff] (!%p2612_p10), %vm628_vm2, %v2159_v53 }
 0xa6f   : > { %v2171_v60 = vld [vmem:[%s2170_s15] sm:$0x1]  ;;  %s2626_s15 = sld [smem:[#allocation4 + $0x7]] }
 0xa70   : > { %v2173_v61 = vld [vmem:[%s2172_s24] sm:$0x1] }
 0xa71   : > { %v2178_v62 = vld [vmem:[%s2177_s27] sm:$0x1]  ;;  %v2174_v5 = vadd.f32 %v2173_v61, %v2171_v60 }
 0xa72   : > { %v2180_v63 = vld [vmem:[%s2179_s29] sm:$0x1] }
 0xa73   : > { %v2181_v0 = vadd.f32 %v2180_v63, %v2178_v62  ;;  %v2185_v31 = vld [vmem:[%s2184_s22] sm:$0x1] }
 0xa74   : > { %v2187_v1 = vld [vmem:[%s2186_s30] sm:$0x1] }
 0xa75   : > { %v2188_v2 = vadd.f32 %v2187_v1, %v2185_v31  ;;  %v2192_v3 = vld [vmem:[%s2191_s6] sm:$0x1]  ;;  %v2225_v14 = vrot.slane %v2181_v0, 7  ;;  %s2219_s26 = scalar_lea.vmem [#allocation2], %s2626_s15 }
 0xa76   : > { %v2194_v4 = vld [vmem:[%s2193_s1] sm:$0x1]  ;;  %s2212_s1 = scalar_lea.vmem [#allocation2], %s2624_s18 }
 0xa77   : > { %v2195_v6 = vadd.f32 %v2194_v4, %v2192_v3  ;;  %v2199_v7 = vld [vmem:[%s2198_s12] sm:$0x1]  ;;  %v2228_v15 = vrot.slane %v2188_v2, 6  ;;  %v2246_v13 = vsel %vm2245_vm8, %v2174_v5, %v2225_v14 }
 0xa78   : > { %v2201_v8 = vld [vmem:[%s2200_s14] sm:$0x1] }
 0xa79   : > { %v2202_v9 = vadd.f32 %v2201_v8, %v2199_v7  ;;  %v2206_v10 = vld [vmem:[%s2205_s19] sm:$0x1]  ;;  %v2231_v16 = vrot.slane %v2195_v6, 5  ;;  %v2248_v33 = vsel %vm2247_vm9, %v2246_v13, %v2228_v15 }
 0xa7a   : > { %v2208_v11 = vld [vmem:[%s2207_s28] sm:$0x1] }
 0xa7b   : > { %v2209_v12 = vadd.f32 %v2208_v11, %v2206_v10  ;;  %v2234_v17 = vrot.slane %v2202_v9, 4  ;;  %v2250_v18 = vsel %vm2249_vm10, %v2248_v33, %v2231_v16  ;;  %v2213_v20 = vld [vmem:[%s2212_s1] sm:$0x1] }
 0xa7c   : > { %v2215_v21 = vld [vmem:[%s2214_s23] sm:$0x1] }
 0xa7d   : > { %v2237_v19 = vrot.slane %v2209_v12, 3  ;;  %v2251_v34 = vsel %vm1528_vm4, %v2250_v18, %v2234_v17  ;;  %v2220_v22 = vld [vmem:[%s2219_s26] sm:$0x1]  ;;  %v2216_v23 = vadd.f32 %v2215_v21, %v2213_v20 }
 0xa7e   : > { %v2222_v24 = vld [vmem:[%s2221_s20] sm:$0x1] }
 0xa7f   : > { %v2223_v25 = vadd.f32 %v2222_v24, %v2220_v22  ;;  %v2253_v26 = vsel %vm2252_vm11, %v2251_v34, %v2237_v19  ;;  %v2240_v27 = vrot.slane %v2216_v23, 2 }
 0xa81   : > { %v2243_v28 = vrot.slane %v2223_v25, 1  ;;  %v2255_v29 = vsel %vm2254_vm12, %v2253_v26, %v2240_v27 }
 0xa83   : > { %v2257_v30 = vsel %vm2256_vm13, %v2255_v29, %v2243_v28 }
 0xa84   : > { %2258 = vst.msk [vmem:[#allocation7] sm:$0xff] %vm628_vm2, %v2257_v30  ;;  %2911 = vmatmul.mubr.msk.f32.vlgmr.msra.gmra.mrb[0].mxu0 %vm628_vm2, %v2257_v30 }
 0xb57   : > { %v2339_v35 = vpop.f32.mrb[0].mxu0 }
 0xb58   : > { %v2340_v36 = vadd.f32 %v2628_v32, %v2339_v35  ;;  %v2912_v37 = vpop.f32.mrb[1].mxu0 }
 0xb5a   : > { %2343 = vst [vmem:[#allocation9] sm:$0xff] %v2340_v36 }
 0xb5b PF: > { %p2933_p11 = scmp.eq.s32.totalorder %s3213_s0, 1  ;;  %s3124_s24 = smov [#allocation7]  }
 0xb5c   : > { %s2364_s27 = sshll.u32 %s3124_s24, 4  ;;  %s3125_s29 = smov [#allocation5]   ;;  %s2365_s27 = int_to_ptr.vmem [resolvable:$true] %s2364_s27 }
 0xb5d   : > { %s2350_s22 = sshll.u32 %s3125_s29, 4  ;;  %s3022_s30 = scalar_lea.vmem %s2365_s27, 128  ;;  %s2351_s22 = int_to_ptr.vmem [resolvable:$true] %s2350_s22 }
 0xb5e   : > { %p3023_p12 = scmp.ne.s32.totalorder %s2365_s27, %s3022_s30  ;;  %p3029_p1 = scmp.lt.s32.totalorder %s2365_s27, %s2365_s27 }
 0xb5f   : > { %p3030_p2 = scmp.lt.s32.totalorder %s3022_s30, %s3022_s30 }
 0xb60   : > { %p3024_p13 = pnand %p3023_p12, %p2933_p11 }
 0xb61   : > { %p3031_p3 = por %p3030_p2, %p3029_p1 }
 0xb62   : > { %p3025_p0 = pneg %p3024_p13 }
 0xb64   : > { %p3032_p4 = pnand %p3031_p3, %p3025_p0 }
 0xb66   : > { %3035 = shalt.err (!%p3032_p4)
}
 0xb67   : > { %s3036_s14 = scalar_lea.hbm %s3623_s13, 128 }
 0xb68   : > { %p3037_p5 = scmp.ne.s32.totalorder %s3623_s13, %s3036_s14  ;;  %p3042_p8 = scmp.lt.u32.totalorder %s3036_s14, %s3623_s13 }
 0xb6a   : > { %p3038_p6 = pnand %p3037_p5, %p2933_p11 }
 0xb6c   : > { %p3039_p7 = pneg %p3038_p6 }
 0xb6e   : > { %p3044_p9 = pnand %p3042_p8, %p3039_p7 }
 0xb70   : > { %3047 = shalt.err (!%p3044_p9)
}
 0xb71   : > { %2924 = dma.vmem_to_hbm [thread:$0]  (%p2933_p11), %s2365_s27, 128, %s3623_s13, [#allocation8]  }
 0xb72   : > { %s3048_s1 = scalar_lea.vmem %s2351_s22, 256  ;;  %p3055_p0 = scmp.lt.s32.totalorder %s2351_s22, %s2351_s22 }
 0xb73   : > { %p3049_p10 = scmp.ne.s32.totalorder %s2351_s22, %s3048_s1  ;;  %p3056_p1 = scmp.lt.s32.totalorder %s3048_s1, %s3048_s1 }
 0xb75   : > { %p3050_p12 = pnand %p3049_p10, %p2933_p11  ;;  %p3057_p2 = por %p3056_p1, %p3055_p0 }
 0xb77   : > { %p3051_p13 = pneg %p3050_p12 }
 0xb79   : > { %p3058_p3 = pnand %p3057_p2, %p3051_p13 }
 0xb7b   : > { %3061 = shalt.err (!%p3058_p3)
}
 0xb7c   : > { %s3635_s20 = sld [smem:[#allocation16_spill]] }
 0xb82   : > { %s3062_s21 = scalar_lea.hbm %s3635_s20, 256 }
 0xb83   : > { %p3063_p4 = scmp.ne.s32.totalorder %s3635_s20, %s3062_s21  ;;  %p3068_p7 = scmp.lt.u32.totalorder %s3062_s21, %s3635_s20 }
 0xb85   : > { %p3064_p5 = pnand %p3063_p4, %p2933_p11 }
 0xb87   : > { %p3065_p6 = pneg %p3064_p5 }
 0xb89   : > { %p3070_p8 = pnand %p3068_p7, %p3065_p6 }
 0xb8b   : > { %3073 = shalt.err (!%p3070_p8)
}
 0xb8c   : > { %s3126_s30 = smov 128   ;;  %s3127_s6 = smov 8  }
 0xb8d   : > { %2922 = dma.vmem_to_hbm [thread:$0]  (%p2933_p11), %s2351_s22, 256, %s3635_s20, [#allocation6], %s3126_s30, %s3126_s30, %s3127_s6  }
 0xb8e   : > { %s3128_s19 = smov [#allocation9]  }
 0xb8f   : > { %s2375_s28 = sshll.u32 %s3128_s19, 4  ;;  %s2376_s28 = int_to_ptr.vmem [resolvable:$true] %s2375_s28 }
 0xb90   : > { %s3074_s18 = scalar_lea.vmem %s2376_s28, 128  ;;  %p3081_p13 = scmp.lt.s32.totalorder %s2376_s28, %s2376_s28 }
 0xb91   : > { %p3075_p9 = scmp.ne.s32.totalorder %s2376_s28, %s3074_s18  ;;  %p3082_p0 = scmp.lt.s32.totalorder %s3074_s18, %s3074_s18 }
 0xb93   : > { %p3076_p10 = pnand %p3075_p9, %p2933_p11  ;;  %p3083_p1 = por %p3082_p0, %p3081_p13 }
 0xb95   : > { %p3077_p12 = pneg %p3076_p10 }
 0xb97   : > { %p3084_p2 = pnand %p3083_p1, %p3077_p12 }
 0xb99   : > { %3087 = shalt.err (!%p3084_p2)
}
 0xb9a   : > { %s3636_s17 = sld [smem:[#allocation17_spill]] }
 0xba0   : > { %s3088_s1 = scalar_lea.hbm %s3636_s17, 128 }
 0xba1   : > { %p3089_p3 = scmp.ne.s32.totalorder %s3636_s17, %s3088_s1  ;;  %p3094_p6 = scmp.lt.u32.totalorder %s3088_s1, %s3636_s17 }
 0xba3   : > { %p3090_p4 = pnand %p3089_p3, %p2933_p11 }
 0xba5   : > { %p3091_p5 = pneg %p3090_p4 }
 0xba7   : > { %p3096_p7 = pnand %p3094_p6, %p3091_p5 }
 0xba9   : > { %3099 = shalt.err (!%p3096_p7)
}
 0xbaa   : > { %2926 = dma.vmem_to_hbm [thread:$0]  (%p2933_p11), %s2376_s28, 128, %s3636_s17, [#allocation8]  }
 0xbab   : > { %3107 = dma.done.wait (%p2933_p11), [#allocation6], 256  }
 0xbac   : > { %3109 = vsyncadd (%p2933_p11), [#allocation6], 4294967040 }
 0xbad   : > { %3111 = dma.done.wait (%p2933_p11), [#allocation8], 256  }
 0xbae   : > { %3113 = vsyncadd (%p2933_p11), [#allocation8], 4294967040 }
 0xbaf PF: > { %s3637_s27 = sld [smem:[#allocation13_spill]] }
 0xbb5   : > { %s33_s18 = sadd.s32 1, %s3637_s27  }
 0xbb6   : > { %p30_p8 = scmp.ge.s32.totalorder %s33_s18, 4  }
 0xbb8   :  { %32 = sbr.rel (!%p30_p8) target bundleno = 19 (0x13), region = 150 }
 0xbbf   :  { %2396 = vsyncpa [#allocation6], 1 }
 0xbc0   :  { %2398 = vsyncpa [#allocation6 + $0x1], 1 }
 0xbc1   :  { %2399 = vsyncpa [#allocation8], 1 }

</bundles_post_ra>
